<compile_context>
chip_gen: v7x
topology: tpu7x:2x2x1
jax: 0.10.0
libtpu: 0.0.40
codegen_flags: <defaults>
</compile_context>

<pallas_src>
import jax
import jax.numpy as jnp
from jax.experimental import pallas as pl
from jax.experimental.pallas import tpu as pltpu


# --------------------- Phase 1: hoisted input projection ---------------------
def input_proj_kernel(x_ref, w_ref, b_ref, o_ref):
    # One well-shaped MXU matmul + bias for ALL timesteps of layer 0.
    o_ref[...] = (
        jnp.dot(x_ref[...], w_ref[...], preferred_element_type=jnp.float32)
        + b_ref[...]
    )


def input_projection(x2d, w, b, *, tile_m=64):
    """x2d: [M, E] (bf16), w: [E, 4H] (bf16), b: [1, 4H] (f32) -> [M, 4H] f32."""
    M, E = x2d.shape
    G = w.shape[1]
    return pl.pallas_call(
        input_proj_kernel,
        out_shape=jax.ShapeDtypeStruct((M, G), jnp.float32),
        grid_spec=pltpu.PrefetchScalarGridSpec(
            num_scalar_prefetch=0,
            grid=(pl.cdiv(M, tile_m),),
            in_specs=[
                pl.BlockSpec((tile_m, E), lambda m: (m, 0)),
                pl.BlockSpec((E, G), lambda m: (0, 0)),
                pl.BlockSpec((1, G), lambda m: (0, 0)),
            ],
            out_specs=pl.BlockSpec((tile_m, G), lambda m: (m, 0)),
        ),
        compiler_params=pltpu.CompilerParams(
            dimension_semantics=("parallel",)),
    )(x2d, w, b)


# ------------- Phase 2: fused 2-layer LSTM recurrence + FC + logsoftmax -------------
def fused_lstm_fc_kernel(xp0_ref, whh0_ref, wih1_ref, whh1_ref, b1_ref,
                         fcw_ref, fcb_ref, o_ref,
                         h0_sc, c0_sc, h1_sc, c1_sc):
    t = pl.program_id(0)

    @pl.when(t == 0)
    def _():
        h0_sc[...] = jnp.zeros_like(h0_sc)
        c0_sc[...] = jnp.zeros_like(c0_sc)
        h1_sc[...] = jnp.zeros_like(h1_sc)
        c1_sc[...] = jnp.zeros_like(c1_sc)

    H = h0_sc.shape[-1]

    def lstm_cell(gates, c_prev):
        # PyTorch gate order i | f | g | o.  H is a multiple of 128 so every slice
        # is lane-dense (no cross-lane shuffles on the serial path).
        i_g = jax.nn.sigmoid(gates[:, 0 * H:1 * H])
        f_g = jax.nn.sigmoid(gates[:, 1 * H:2 * H])
        g_g = jnp.tanh(gates[:, 2 * H:3 * H])
        o_g = jax.nn.sigmoid(gates[:, 3 * H:4 * H])
        c_new = f_g * c_prev + i_g * g_g
        h_new = o_g * jnp.tanh(c_new)
        return h_new, c_new

    # ---- layer 0: input projection (and both biases) already precomputed ----
    gates0 = xp0_ref[0] + jnp.dot(
        h0_sc[...].astype(jnp.bfloat16), whh0_ref[...],
        preferred_element_type=jnp.float32)
    h0_new, c0_new = lstm_cell(gates0, c0_sc[...])
    h0_sc[...] = h0_new
    c0_sc[...] = c0_new

    # ---- layer 1 (its input is layer-0's fresh hidden state, VMEM-resident) ----
    # TODO(synk): nn.LSTM inter-layer dropout (p=0.5) is training-only; eval = identity.
    gates1 = (
        jnp.dot(h0_new.astype(jnp.bfloat16), wih1_ref[...],
                preferred_element_type=jnp.float32)
        + jnp.dot(h1_sc[...].astype(jnp.bfloat16), whh1_ref[...],
                  preferred_element_type=jnp.float32)
        + b1_ref[...]
    )
    h1_new, c1_new = lstm_cell(gates1, c1_sc[...])
    h1_sc[...] = h1_new
    c1_sc[...] = c1_new

    # ---- final FC + log_softmax only on the last timestep ----
    @pl.when(t == pl.num_programs(0) - 1)
    def _():
        # TODO(synk): nn.Dropout(p=0.5) before fc is identity in eval mode.
        logits = (
            jnp.dot(h1_new.astype(jnp.bfloat16), fcw_ref[...],
                    preferred_element_type=jnp.float32)
            + fcb_ref[...]
        )
        m = jnp.max(logits, axis=-1, keepdims=True)
        z = logits - m
        lse = jnp.log(jnp.sum(jnp.exp(z), axis=-1, keepdims=True))
        o_ref[...] = z - lse


def fused_lstm_fc(xproj0, w_hh0, w_ih1, w_hh1, b1, fc_w, fc_b):
    """xproj0: [T, B, 4H] f32 (time-major, bias folded).  Returns [B, O] log-probs."""
    T, B, G = xproj0.shape
    H = G // 4
    O = fc_w.shape[1]
    return pl.pallas_call(
        fused_lstm_fc_kernel,
        out_shape=jax.ShapeDtypeStruct((B, O), jnp.float32),
        grid_spec=pltpu.PrefetchScalarGridSpec(
            num_scalar_prefetch=0,
            grid=(T,),
            in_specs=[
                pl.BlockSpec((1, B, G), lambda t: (t, 0, 0)),   # per-step precomputed gates
                pl.BlockSpec((H, G), lambda t: (0, 0)),          # W_hh0 (resident)
                pl.BlockSpec((H, G), lambda t: (0, 0)),          # W_ih1 (resident)
                pl.BlockSpec((H, G), lambda t: (0, 0)),          # W_hh1 (resident)
                pl.BlockSpec((1, G), lambda t: (0, 0)),          # b1
                pl.BlockSpec((H, O), lambda t: (0, 0)),          # fc_w
                pl.BlockSpec((1, O), lambda t: (0, 0)),          # fc_b
            ],
            # Constant index map: output lives in VMEM across all timesteps and is
            # written back to HBM exactly once (only the last hidden state matters).
            out_specs=pl.BlockSpec((B, O), lambda t: (0, 0)),
            scratch_shapes=[pltpu.VMEM((B, H), jnp.float32)] * 4,  # h0, c0, h1, c1
        ),
        compiler_params=pltpu.CompilerParams(
            dimension_semantics=("arbitrary",)),  # time recurrence is sequential
    )(xproj0, w_hh0, w_ih1, w_hh1, b1, fc_w, fc_b)


# ------------------------------- Full forward --------------------------------
def rnn_forward(token_ids, params):
    """token_ids: [B, T] int32. Returns log-probs [B, output_size]."""
    # Embedding lookup is a pure gather -> plain JAX glue, not compute.
    embeds = params["embedding"][token_ids]              # [B, T, E] f32
    x = jnp.transpose(embeds, (1, 0, 2))                 # [T, B, E] time-major
    T, B, E = x.shape
    H = params["w_hh0"].shape[0]

    # bf16 for the MXU; accumulation and state stay f32.
    bf = jnp.bfloat16
    x2d = x.reshape(T * B, E).astype(bf)

    # Phase 1: hoist layer-0 input projection (+ folded bias) out of the recurrence.
    xproj0 = input_projection(
        x2d, params["w_ih0"].astype(bf), params["b0"]).reshape(T, B, 4 * H)

    # Phase 2: fused recurrence over time + final FC + log_softmax.
    return fused_lstm_fc(
        xproj0,
        params["w_hh0"].astype(bf),
        params["w_ih1"].astype(bf),
        params["w_hh1"].astype(bf),
        params["b1"],
        params["fc_w"].astype(bf),
        params["fc_b"],
    )


# ------------------------------ Reference (pure JAX) ------------------------------
def rnn_forward_ref(token_ids, params):
    embeds = params["embedding"][token_ids]
    x = jnp.transpose(embeds, (1, 0, 2))
    T, B, _ = x.shape
    H = params["w_hh0"].shape[0]

    def cell(x_t, h, c, w_ih, w_hh, b):
        g = x_t @ w_ih + h @ w_hh + b
        i = jax.nn.sigmoid(g[:, :H])
        f = jax.nn.sigmoid(g[:, H:2 * H])
        gg = jnp.tanh(g[:, 2 * H:3 * H])
        o = jax.nn.sigmoid(g[:, 3 * H:])
        c = f * c + i * gg
        return o * jnp.tanh(c), c

    h0 = c0 = h1 = c1 = jnp.zeros((B, H), jnp.float32)
    for t in range(T):
        h0, c0 = cell(x[t], h0, c0, params["w_ih0"], params["w_hh0"], params["b0"])
        h1, c1 = cell(h0, h1, c1, params["w_ih1"], params["w_hh1"], params["b1"])
    logits = h1 @ params["fc_w"] + params["fc_b"]
    return jax.nn.log_softmax(logits, axis=-1)


def init_params(key, vocab_size, embedding_dim, hidden_dim, output_size):
    ks = jax.random.split(key, 12)
    H = hidden_dim
    s = 1.0 / jnp.sqrt(jnp.float32(H))

    def u(k, shape):
        return jax.random.uniform(k, shape, jnp.float32, -s, s)

    return {
        "embedding": jax.random.normal(ks[0], (vocab_size, embedding_dim),
                                       jnp.float32) * 0.1,
        # PyTorch weight_ih_l0 is [4H, E]; stored transposed [E, 4H]. Gate order i|f|g|o.
        "w_ih0": u(ks[1], (embedding_dim, 4 * H)),
        "w_hh0": u(ks[2], (H, 4 * H)),
        "b0": (u(ks[3], (1, 4 * H)) + u(ks[4], (1, 4 * H))),  # b_ih + b_hh folded
        "w_ih1": u(ks[5], (H, 4 * H)),
        "w_hh1": u(ks[6], (H, 4 * H)),
        "b1": (u(ks[7], (1, 4 * H)) + u(ks[8], (1, 4 * H))),
        "fc_w": u(ks[9], (H, output_size)),
        "fc_b": u(ks[10], (1, output_size)),
    }


if __name__ == "__main__":
    # Small shapes consistent with the module spec (hidden_dim=128, E=300, 6 classes).
    vocab_size = 50
    embedding_dim = 300
    hidden_dim = 128
    output_size = 6
    B, T = 8, 8           # batch padded to >=8 so vreg sublanes / MXU rows are used

    key = jax.random.PRNGKey(0)
    pkey, ikey = jax.random.split(key)
    params = init_params(pkey, vocab_size, embedding_dim, hidden_dim, output_size)
    token_ids = jax.random.randint(ikey, (B, T), 0, vocab_size, dtype=jnp.int32)

    out = jax.jit(rnn_forward)(token_ids, params)
    jax.block_until_ready(out)
    assert out.shape == (B, output_size)

    # Sanity: log_softmax rows sum to ~1 in prob space.
    assert bool(jnp.all(jnp.abs(jnp.sum(jnp.exp(out), axis=1) - 1.0) < 1e-3))

    # Numerical check against a pure-JAX reference (bf16 MXU path -> loose tolerance).
    ref = rnn_forward_ref(token_ids, params)
    assert bool(jnp.all(jnp.abs(out - ref) < 5e-2))

    print("KERNEL_OK")
</pallas_src>

<mosaic_0001>
module attributes {stable_mosaic.version = 11 : i64} {
  func.func @input_proj_kernel(%arg0: i32, %arg1: memref<64x300xbf16, #tpu.memory_space<vmem>>, %arg2: memref<300x512xbf16, #tpu.memory_space<vmem>>, %arg3: memref<1x512xf32, #tpu.memory_space<vmem>>, %arg4: memref<64x512xf32, #tpu.memory_space<vmem>>) attributes {dimension_semantics = [#tpu.dimension_semantics<parallel>], iteration_bounds = array<i64: 1>, scalar_prefetch = 0 : i64, scratch_operands = 0 : i64, tpu.core_type = #tpu.core_type<tc>, window_params = [{transform_indices = @transform_0, window_bounds = array<i64: 64, 300>}, {pipeline_mode = #tpu.pipeline_mode<synchronous>, transform_indices = @transform_1, window_bounds = array<i64: 300, 512>}, {pipeline_mode = #tpu.pipeline_mode<synchronous>, transform_indices = @transform_2, window_bounds = array<i64: 1, 512>}, {transform_indices = @transform_3, window_bounds = array<i64: 64, 512>}]} {
    %c0 = arith.constant 0 : index
    %c0_0 = arith.constant 0 : index
    %0 = vector.load %arg1[%c0, %c0_0] : memref<64x300xbf16, #tpu.memory_space<vmem>>, vector<64x300xbf16>
    %c0_1 = arith.constant 0 : index
    %c0_2 = arith.constant 0 : index
    %1 = vector.load %arg2[%c0_1, %c0_2] : memref<300x512xbf16, #tpu.memory_space<vmem>>, vector<300x512xbf16>
    %cst = arith.constant dense<0.000000e+00> : vector<64x512xf32>
    %2 = tpu.matmul %0, %1, %cst {dimension_numbers = #tpu.dot_dimension_numbers<[1], [0], [0], [1], [0, 0, 1, 1], [], []>} : vector<64x300xbf16>, vector<300x512xbf16>, vector<64x512xf32> -> vector<64x512xf32>
    %c0_3 = arith.constant 0 : index
    %c0_4 = arith.constant 0 : index
    %3 = vector.load %arg3[%c0_3, %c0_4] : memref<1x512xf32, #tpu.memory_space<vmem>>, vector<1x512xf32>
    %4 = vector.broadcast %3 : vector<1x512xf32> to vector<64x512xf32>
    %5 = arith.addf %2, %4 : vector<64x512xf32>
    %c0_5 = arith.constant 0 : index
    %c0_6 = arith.constant 0 : index
    %6 = vector.load %arg4[%c0_5, %c0_6] : memref<64x512xf32, #tpu.memory_space<vmem>>, vector<64x512xf32>
    tpu.vector_store %arg4[%c0_5, %c0_6], %5 {strides = array<i32>} : memref<64x512xf32, #tpu.memory_space<vmem>>, vector<64x512xf32>,
    return
  }
  func.func @transform_0(%arg0: i32) -> (i32, i32) {
    %c0_i32 = arith.constant 0 : i32
    %c0_i32_0 = arith.constant 0 : i32
    return %arg0, %c0_i32 : i32, i32
  }
  func.func @transform_1(%arg0: i32) -> (i32, i32) {
    %c0_i32 = arith.constant 0 : i32
    %c0_i32_0 = arith.constant 0 : i32
    %c0_i32_1 = arith.constant 0 : i32
    return %c0_i32, %c0_i32_0 : i32, i32
  }
  func.func @transform_2(%arg0: i32) -> (i32, i32) {
    %c0_i32 = arith.constant 0 : i32
    %c0_i32_0 = arith.constant 0 : i32
    %c0_i32_1 = arith.constant 0 : i32
    return %c0_i32, %c0_i32_0 : i32, i32
  }
  func.func @transform_3(%arg0: i32) -> (i32, i32) {
    %c0_i32 = arith.constant 0 : i32
    %c0_i32_0 = arith.constant 0 : i32
    return %arg0, %c0_i32 : i32, i32
  }
}

module attributes {stable_mosaic.version = 11 : i64} {
  func.func @fused_lstm_fc_kernel(%arg0: i32, %arg1: memref<1x8x512xf32, #tpu.memory_space<vmem>>, %arg2: memref<128x512xbf16, #tpu.memory_space<vmem>>, %arg3: memref<128x512xbf16, #tpu.memory_space<vmem>>, %arg4: memref<128x512xbf16, #tpu.memory_space<vmem>>, %arg5: memref<1x512xf32, #tpu.memory_space<vmem>>, %arg6: memref<128x6xbf16, #tpu.memory_space<vmem>>, %arg7: memref<1x6xf32, #tpu.memory_space<vmem>>, %arg8: memref<8x6xf32, #tpu.memory_space<vmem>>, %arg9: memref<8x128xf32, #tpu.memory_space<vmem>>, %arg10: memref<8x128xf32, #tpu.memory_space<vmem>>, %arg11: memref<8x128xf32, #tpu.memory_space<vmem>>, %arg12: memref<8x128xf32, #tpu.memory_space<vmem>>) attributes {dimension_semantics = [#tpu.dimension_semantics<arbitrary>], iteration_bounds = array<i64: 8>, scalar_prefetch = 0 : i64, scratch_operands = 4 : i64, tpu.core_type = #tpu.core_type<tc>, window_params = [{transform_indices = @transform_0, window_bounds = array<i64: 1, 8, 512>}, {pipeline_mode = #tpu.pipeline_mode<synchronous>, transform_indices = @transform_1, window_bounds = array<i64: 128, 512>}, {pipeline_mode = #tpu.pipeline_mode<synchronous>, transform_indices = @transform_2, window_bounds = array<i64: 128, 512>}, {pipeline_mode = #tpu.pipeline_mode<synchronous>, transform_indices = @transform_3, window_bounds = array<i64: 128, 512>}, {pipeline_mode = #tpu.pipeline_mode<synchronous>, transform_indices = @transform_4, window_bounds = array<i64: 1, 512>}, {pipeline_mode = #tpu.pipeline_mode<synchronous>, transform_indices = @transform_5, window_bounds = array<i64: 128, 6>}, {pipeline_mode = #tpu.pipeline_mode<synchronous>, transform_indices = @transform_6, window_bounds = array<i64: 1, 6>}, {pipeline_mode = #tpu.pipeline_mode<synchronous>, transform_indices = @transform_7, window_bounds = array<i64: 8, 6>}]} {
    %c0_i32 = arith.constant 0 : i32
    %0 = arith.cmpi eq, %arg0, %c0_i32 : i32
    %1 = arith.extui %0 : i1 to i32
    %c0_i32_0 = arith.constant 0 : i32
    %2 = arith.cmpi ne, %1, %c0_i32_0 : i32
    scf.if %2 {
      %cst_36 = arith.constant 0.000000e+00 : f32
      %80 = vector.broadcast %cst_36 : f32 to vector<8x128xf32>
      %c0_37 = arith.constant 0 : index
      %c0_38 = arith.constant 0 : index
      %81 = vector.load %arg9[%c0_37, %c0_38] : memref<8x128xf32, #tpu.memory_space<vmem>>, vector<8x128xf32>
      tpu.vector_store %arg9[%c0_37, %c0_38], %80 {strides = array<i32>} : memref<8x128xf32, #tpu.memory_space<vmem>>, vector<8x128xf32>,
      %cst_39 = arith.constant 0.000000e+00 : f32
      %82 = vector.broadcast %cst_39 : f32 to vector<8x128xf32>
      %c0_40 = arith.constant 0 : index
      %c0_41 = arith.constant 0 : index
      %83 = vector.load %arg10[%c0_40, %c0_41] : memref<8x128xf32, #tpu.memory_space<vmem>>, vector<8x128xf32>
      tpu.vector_store %arg10[%c0_40, %c0_41], %82 {strides = array<i32>} : memref<8x128xf32, #tpu.memory_space<vmem>>, vector<8x128xf32>,
      %cst_42 = arith.constant 0.000000e+00 : f32
      %84 = vector.broadcast %cst_42 : f32 to vector<8x128xf32>
      %c0_43 = arith.constant 0 : index
      %c0_44 = arith.constant 0 : index
      %85 = vector.load %arg11[%c0_43, %c0_44] : memref<8x128xf32, #tpu.memory_space<vmem>>, vector<8x128xf32>
      tpu.vector_store %arg11[%c0_43, %c0_44], %84 {strides = array<i32>} : memref<8x128xf32, #tpu.memory_space<vmem>>, vector<8x128xf32>,
      %cst_45 = arith.constant 0.000000e+00 : f32
      %86 = vector.broadcast %cst_45 : f32 to vector<8x128xf32>
      %c0_46 = arith.constant 0 : index
      %c0_47 = arith.constant 0 : index
      %87 = vector.load %arg12[%c0_46, %c0_47] : memref<8x128xf32, #tpu.memory_space<vmem>>, vector<8x128xf32>
      tpu.vector_store %arg12[%c0_46, %c0_47], %86 {strides = array<i32>} : memref<8x128xf32, #tpu.memory_space<vmem>>, vector<8x128xf32>,
    } else {
    }
    %c0 = arith.constant 0 : index
    %c0_1 = arith.constant 0 : index
    %c0_2 = arith.constant 0 : index
    %3 = vector.load %arg1[%c0, %c0_1, %c0_2] : memref<1x8x512xf32, #tpu.memory_space<vmem>>, vector<1x8x512xf32>
    %4 = vector.shape_cast %3 : vector<1x8x512xf32> to vector<8x512xf32>
    %c0_3 = arith.constant 0 : index
    %c0_4 = arith.constant 0 : index
    %5 = vector.load %arg9[%c0_3, %c0_4] : memref<8x128xf32, #tpu.memory_space<vmem>>, vector<8x128xf32>
    %6 = arith.truncf %5 : vector<8x128xf32> to vector<8x128xbf16>
    %c0_5 = arith.constant 0 : index
    %c0_6 = arith.constant 0 : index
    %7 = vector.load %arg2[%c0_5, %c0_6] : memref<128x512xbf16, #tpu.memory_space<vmem>>, vector<128x512xbf16>
    %cst = arith.constant dense<0.000000e+00> : vector<8x512xf32>
    %8 = tpu.matmul %6, %7, %cst {dimension_numbers = #tpu.dot_dimension_numbers<[1], [0], [0], [1], [0, 0, 1, 1], [], []>} : vector<8x128xbf16>, vector<128x512xbf16>, vector<8x512xf32> -> vector<8x512xf32>
    %9 = arith.addf %4, %8 : vector<8x512xf32>
    %c0_7 = arith.constant 0 : index
    %c0_8 = arith.constant 0 : index
    %10 = vector.load %arg10[%c0_7, %c0_8] : memref<8x128xf32, #tpu.memory_space<vmem>>, vector<8x128xf32>
    %11 = vector.extract_strided_slice %9 {offsets = [0, 0], sizes = [8, 128], strides = [1, 1]} : vector<8x512xf32> to vector<8x128xf32>
    %12 = arith.negf %11 : vector<8x128xf32>
    %13 = math.exp %12 : vector<8x128xf32>
    %cst_9 = arith.constant 1.000000e+00 : f32
    %14 = vector.broadcast %cst_9 : f32 to vector<8x128xf32>
    %15 = arith.addf %14, %13 : vector<8x128xf32>
    %16 = arith.divf %14, %15 : vector<8x128xf32>
    %17 = vector.extract_strided_slice %9 {offsets = [0, 128], sizes = [8, 128], strides = [1, 1]} : vector<8x512xf32> to vector<8x128xf32>
    %18 = arith.negf %17 : vector<8x128xf32>
    %19 = math.exp %18 : vector<8x128xf32>
    %cst_10 = arith.constant 1.000000e+00 : f32
    %20 = vector.broadcast %cst_10 : f32 to vector<8x128xf32>
    %21 = arith.addf %20, %19 : vector<8x128xf32>
    %22 = arith.divf %20, %21 : vector<8x128xf32>
    %23 = vector.extract_strided_slice %9 {offsets = [0, 256], sizes = [8, 128], strides = [1, 1]} : vector<8x512xf32> to vector<8x128xf32>
    %24 = math.tanh %23 : vector<8x128xf32>
    %25 = vector.extract_strided_slice %9 {offsets = [0, 384], sizes = [8, 128], strides = [1, 1]} : vector<8x512xf32> to vector<8x128xf32>
    %26 = arith.negf %25 : vector<8x128xf32>
    %27 = math.exp %26 : vector<8x128xf32>
    %cst_11 = arith.constant 1.000000e+00 : f32
    %28 = vector.broadcast %cst_11 : f32 to vector<8x128xf32>
    %29 = arith.addf %28, %27 : vector<8x128xf32>
    %30 = arith.divf %28, %29 : vector<8x128xf32>
    %31 = arith.mulf %22, %10 : vector<8x128xf32>
    %32 = arith.mulf %16, %24 : vector<8x128xf32>
    %33 = arith.addf %31, %32 : vector<8x128xf32>
    %34 = math.tanh %33 : vector<8x128xf32>
    %35 = arith.mulf %30, %34 : vector<8x128xf32>
    %c0_12 = arith.constant 0 : index
    %c0_13 = arith.constant 0 : index
    %36 = vector.load %arg9[%c0_12, %c0_13] : memref<8x128xf32, #tpu.memory_space<vmem>>, vector<8x128xf32>
    tpu.vector_store %arg9[%c0_12, %c0_13], %35 {strides = array<i32>} : memref<8x128xf32, #tpu.memory_space<vmem>>, vector<8x128xf32>,
    %c0_14 = arith.constant 0 : index
    %c0_15 = arith.constant 0 : index
    %37 = vector.load %arg10[%c0_14, %c0_15] : memref<8x128xf32, #tpu.memory_space<vmem>>, vector<8x128xf32>
    tpu.vector_store %arg10[%c0_14, %c0_15], %33 {strides = array<i32>} : memref<8x128xf32, #tpu.memory_space<vmem>>, vector<8x128xf32>,
    %38 = arith.truncf %35 : vector<8x128xf32> to vector<8x128xbf16>
    %c0_16 = arith.constant 0 : index
    %c0_17 = arith.constant 0 : index
    %39 = vector.load %arg3[%c0_16, %c0_17] : memref<128x512xbf16, #tpu.memory_space<vmem>>, vector<128x512xbf16>
    %cst_18 = arith.constant dense<0.000000e+00> : vector<8x512xf32>
    %40 = tpu.matmul %38, %39, %cst_18 {dimension_numbers = #tpu.dot_dimension_numbers<[1], [0], [0], [1], [0, 0, 1, 1], [], []>} : vector<8x128xbf16>, vector<128x512xbf16>, vector<8x512xf32> -> vector<8x512xf32>
    %c0_19 = arith.constant 0 : index
    %c0_20 = arith.constant 0 : index
    %41 = vector.load %arg11[%c0_19, %c0_20] : memref<8x128xf32, #tpu.memory_space<vmem>>, vector<8x128xf32>
    %42 = arith.truncf %41 : vector<8x128xf32> to vector<8x128xbf16>
    %c0_21 = arith.constant 0 : index
    %c0_22 = arith.constant 0 : index
    %43 = vector.load %arg4[%c0_21, %c0_22] : memref<128x512xbf16, #tpu.memory_space<vmem>>, vector<128x512xbf16>
    %cst_23 = arith.constant dense<0.000000e+00> : vector<8x512xf32>
    %44 = tpu.matmul %42, %43, %cst_23 {dimension_numbers = #tpu.dot_dimension_numbers<[1], [0], [0], [1], [0, 0, 1, 1], [], []>} : vector<8x128xbf16>, vector<128x512xbf16>, vector<8x512xf32> -> vector<8x512xf32>
    %45 = arith.addf %40, %44 : vector<8x512xf32>
    %c0_24 = arith.constant 0 : index
    %c0_25 = arith.constant 0 : index
    %46 = vector.load %arg5[%c0_24, %c0_25] : memref<1x512xf32, #tpu.memory_space<vmem>>, vector<1x512xf32>
    %47 = vector.broadcast %46 : vector<1x512xf32> to vector<8x512xf32>
    %48 = arith.addf %45, %47 : vector<8x512xf32>
    %c0_26 = arith.constant 0 : index
    %c0_27 = arith.constant 0 : index
    %49 = vector.load %arg12[%c0_26, %c0_27] : memref<8x128xf32, #tpu.memory_space<vmem>>, vector<8x128xf32>
    %50 = vector.extract_strided_slice %48 {offsets = [0, 0], sizes = [8, 128], strides = [1, 1]} : vector<8x512xf32> to vector<8x128xf32>
    %51 = arith.negf %50 : vector<8x128xf32>
    %52 = math.exp %51 : vector<8x128xf32>
    %cst_28 = arith.constant 1.000000e+00 : f32
    %53 = vector.broadcast %cst_28 : f32 to vector<8x128xf32>
    %54 = arith.addf %53, %52 : vector<8x128xf32>
    %55 = arith.divf %53, %54 : vector<8x128xf32>
    %56 = vector.extract_strided_slice %48 {offsets = [0, 128], sizes = [8, 128], strides = [1, 1]} : vector<8x512xf32> to vector<8x128xf32>
    %57 = arith.negf %56 : vector<8x128xf32>
    %58 = math.exp %57 : vector<8x128xf32>
    %cst_29 = arith.constant 1.000000e+00 : f32
    %59 = vector.broadcast %cst_29 : f32 to vector<8x128xf32>
    %60 = arith.addf %59, %58 : vector<8x128xf32>
    %61 = arith.divf %59, %60 : vector<8x128xf32>
    %62 = vector.extract_strided_slice %48 {offsets = [0, 256], sizes = [8, 128], strides = [1, 1]} : vector<8x512xf32> to vector<8x128xf32>
    %63 = math.tanh %62 : vector<8x128xf32>
    %64 = vector.extract_strided_slice %48 {offsets = [0, 384], sizes = [8, 128], strides = [1, 1]} : vector<8x512xf32> to vector<8x128xf32>
    %65 = arith.negf %64 : vector<8x128xf32>
    %66 = math.exp %65 : vector<8x128xf32>
    %cst_30 = arith.constant 1.000000e+00 : f32
    %67 = vector.broadcast %cst_30 : f32 to vector<8x128xf32>
    %68 = arith.addf %67, %66 : vector<8x128xf32>
    %69 = arith.divf %67, %68 : vector<8x128xf32>
    %70 = arith.mulf %61, %49 : vector<8x128xf32>
    %71 = arith.mulf %55, %63 : vector<8x128xf32>
    %72 = arith.addf %70, %71 : vector<8x128xf32>
    %73 = math.tanh %72 : vector<8x128xf32>
    %74 = arith.mulf %69, %73 : vector<8x128xf32>
    %c0_31 = arith.constant 0 : index
    %c0_32 = arith.constant 0 : index
    %75 = vector.load %arg11[%c0_31, %c0_32] : memref<8x128xf32, #tpu.memory_space<vmem>>, vector<8x128xf32>
    tpu.vector_store %arg11[%c0_31, %c0_32], %74 {strides = array<i32>} : memref<8x128xf32, #tpu.memory_space<vmem>>, vector<8x128xf32>,
    %c0_33 = arith.constant 0 : index
    %c0_34 = arith.constant 0 : index
    %76 = vector.load %arg12[%c0_33, %c0_34] : memref<8x128xf32, #tpu.memory_space<vmem>>, vector<8x128xf32>
    tpu.vector_store %arg12[%c0_33, %c0_34], %72 {strides = array<i32>} : memref<8x128xf32, #tpu.memory_space<vmem>>, vector<8x128xf32>,
    %c7_i32 = arith.constant 7 : i32
    %77 = arith.cmpi eq, %arg0, %c7_i32 : i32
    %78 = arith.extui %77 : i1 to i32
    %c0_i32_35 = arith.constant 0 : i32
    %79 = arith.cmpi ne, %78, %c0_i32_35 : i32
    scf.if %79 {
      %80 = arith.truncf %74 : vector<8x128xf32> to vector<8x128xbf16>
      %c0_36 = arith.constant 0 : index
      %c0_37 = arith.constant 0 : index
      %81 = vector.load %arg6[%c0_36, %c0_37] : memref<128x6xbf16, #tpu.memory_space<vmem>>, vector<128x6xbf16>
      %cst_38 = arith.constant dense<0.000000e+00> : vector<8x6xf32>
      %82 = tpu.matmul %80, %81, %cst_38 {dimension_numbers = #tpu.dot_dimension_numbers<[1], [0], [0], [1], [0, 0, 1, 1], [], []>} : vector<8x128xbf16>, vector<128x6xbf16>, vector<8x6xf32> -> vector<8x6xf32>
      %c0_39 = arith.constant 0 : index
      %c0_40 = arith.constant 0 : index
      %83 = vector.load %arg7[%c0_39, %c0_40] : memref<1x6xf32, #tpu.memory_space<vmem>>, vector<1x6xf32>
      %84 = vector.broadcast %83 : vector<1x6xf32> to vector<8x6xf32>
      %85 = arith.addf %82, %84 : vector<8x6xf32>
      %cst_41 = arith.constant dense<0xFF800000> : vector<8xf32>
      %86 = vector.multi_reduction <maximumf>, %85, %cst_41 [1] : vector<8x6xf32> to vector<8xf32>
      %87 = vector.shape_cast %86 : vector<8xf32> to vector<8x1xf32>
      %88 = vector.broadcast %87 : vector<8x1xf32> to vector<8x6xf32>
      %89 = arith.subf %85, %88 : vector<8x6xf32>
      %90 = math.exp %89 : vector<8x6xf32>
      %cst_42 = arith.constant dense<0.000000e+00> : vector<8xf32>
      %91 = vector.multi_reduction <add>, %90, %cst_42 [1] : vector<8x6xf32> to vector<8xf32>
      %92 = vector.shape_cast %91 : vector<8xf32> to vector<8x1xf32>
      %93 = math.log %92 : vector<8x1xf32>
      %94 = vector.broadcast %93 : vector<8x1xf32> to vector<8x6xf32>
      %95 = arith.subf %89, %94 : vector<8x6xf32>
      %c0_43 = arith.constant 0 : index
      %c0_44 = arith.constant 0 : index
      %96 = vector.load %arg8[%c0_43, %c0_44] : memref<8x6xf32, #tpu.memory_space<vmem>>, vector<8x6xf32>
      tpu.vector_store %arg8[%c0_43, %c0_44], %95 {strides = array<i32>} : memref<8x6xf32, #tpu.memory_space<vmem>>, vector<8x6xf32>,
    } else {
    }
    return
  }
  func.func @transform_0(%arg0: i32) -> (i32, i32, i32) {
    %c0_i32 = arith.constant 0 : i32
    %c0_i32_0 = arith.constant 0 : i32
    %c0_i32_1 = arith.constant 0 : i32
    return %arg0, %c0_i32, %c0_i32_0 : i32, i32, i32
  }
  func.func @transform_1(%arg0: i32) -> (i32, i32) {
    %c0_i32 = arith.constant 0 : i32
    %c0_i32_0 = arith.constant 0 : i32
    %c0_i32_1 = arith.constant 0 : i32
    return %c0_i32, %c0_i32_0 : i32, i32
  }
  func.func @transform_2(%arg0: i32) -> (i32, i32) {
    %c0_i32 = arith.constant 0 : i32
    %c0_i32_0 = arith.constant 0 : i32
    %c0_i32_1 = arith.constant 0 : i32
    return %c0_i32, %c0_i32_0 : i32, i32
  }
  func.func @transform_3(%arg0: i32) -> (i32, i32) {
    %c0_i32 = arith.constant 0 : i32
    %c0_i32_0 = arith.constant 0 : i32
    %c0_i32_1 = arith.constant 0 : i32
    return %c0_i32, %c0_i32_0 : i32, i32
  }
  func.func @transform_4(%arg0: i32) -> (i32, i32) {
    %c0_i32 = arith.constant 0 : i32
    %c0_i32_0 = arith.constant 0 : i32
    %c0_i32_1 = arith.constant 0 : i32
    return %c0_i32, %c0_i32_0 : i32, i32
  }
  func.func @transform_5(%arg0: i32) -> (i32, i32) {
    %c0_i32 = arith.constant 0 : i32
    %c0_i32_0 = arith.constant 0 : i32
    %c0_i32_1 = arith.constant 0 : i32
    return %c0_i32, %c0_i32_0 : i32, i32
  }
  func.func @transform_6(%arg0: i32) -> (i32, i32) {
    %c0_i32 = arith.constant 0 : i32
    %c0_i32_0 = arith.constant 0 : i32
    %c0_i32_1 = arith.constant 0 : i32
    return %c0_i32, %c0_i32_0 : i32, i32
  }
  func.func @transform_7(%arg0: i32) -> (i32, i32) {
    %c0_i32 = arith.constant 0 : i32
    %c0_i32_0 = arith.constant 0 : i32
    %c0_i32_1 = arith.constant 0 : i32
    return %c0_i32, %c0_i32_0 : i32, i32
  }
}

</mosaic_0001>

<bundles_post_ra>
// kernel: rnn_forward.2
= control target key start
LH: loop header
LB: loop body
LE: loop exit
PB: predicated region body
PF: predicated region fallthrough
CT: control target
= control target key end

     0   :  { %vm578_vm0 = vcmask 1045504   ;;  %vm565_vm1 = vcmask 359424   ;;  %s1648_s1 = inlined_call_operand.vmem [shape: bf16[300,512], index: 1, kind: input, shape index: {}]   ;;  %s1649_s0 = inlined_call_operand.vmem [shape: bf16[64,300], index: 0, kind: input, shape index: {}]   ;;  %s1650_s2 = inlined_call_operand.vmem [shape: f32[1,512], index: 2, kind: input, shape index: {}]   ;;  %s1651_s3 = inlined_call_operand.vmem [shape: f32[64,512], index: 3, kind: output, shape index: {}]  }
   0x1   :  { %v1082_v0 = vld [vmem:[%s1648_s1 + $0x4] ss:$16 sps:$4 sm:$0xff]   ;;  %v1084_v1 = vld [vmem:[%s1648_s1 + $0xc] ss:$16 sps:$4 sm:$0xff]   ;;  %v1086_v2 = vld [vmem:[%s1648_s1] ss:$16 sps:$4 sm:$0xff]  }
   0x2   :  { %591 = vmatprep.subr.bf16.mxu0 %v1082_v0  ;;  %v1087_v3 = vld [vmem:[%s1648_s1 + $0x8] ss:$16 sps:$4 sm:$0xff]   ;;  %737 = vmatprep.subr.bf16.mxu1 %v1084_v1  ;;  %v1088_v4 = vld [vmem:[%s1648_s1 + $0x24] ss:$16 sps:$4 sm:$0xff]   ;;  %v1090_v5 = vld [vmem:[%s1648_s1 + $0x2c] ss:$16 sps:$4 sm:$0xff]  }
   0x3   :  { %592 = vmatpush1.bf16.msra.mxu0 %v1086_v2  ;;  %738 = vmatpush1.bf16.msra.mxu1 %v1087_v3  ;;  %v1092_v6 = vld [vmem:[%s1648_s1 + $0x20] ss:$16 sps:$4 sm:$0xff]   ;;  %v1093_v7 = vld [vmem:[%s1648_s1 + $0x28] ss:$16 sps:$4 sm:$0xff]   ;;  %v1094_v8 = vld [vmem:[%s1648_s1 + $0x44] ss:$16 sps:$4 sm:$0xff]  }
   0x4   :  { %593 = vmatprep.subr.bf16.mxu0 %v1088_v4  ;;  %739 = vmatprep.subr.bf16.mxu1 %v1090_v5  ;;  %v1096_v9 = vld [vmem:[%s1648_s1 + $0x4c] ss:$16 sps:$4 sm:$0xff]   ;;  %v1098_v10 = vld [vmem:[%s1648_s1 + $0x40] ss:$16 sps:$4 sm:$0xff]   ;;  %v1099_v11 = vld [vmem:[%s1648_s1 + $0x48] ss:$16 sps:$4 sm:$0xff]  }
   0x5   :  { %v1100_v12 = vld [vmem:[%s1648_s1 + $0x64] ss:$16 sps:$4 sm:$0xff]   ;;  %v1102_v13 = vld [vmem:[%s1648_s1 + $0x6c] ss:$16 sps:$4 sm:$0xff]   ;;  %v1104_v14 = vld [vmem:[%s1648_s1 + $0x60] ss:$16 sps:$4 sm:$0xff]  }
   0x6   :  { %v1105_v15 = vld [vmem:[%s1648_s1 + $0x68] ss:$16 sps:$4 sm:$0xff]   ;;  %v1106_v16 = vld [vmem:[%s1648_s1 + $0x84] ss:$16 sps:$4 sm:$0xff]   ;;  %v1108_v17 = vld [vmem:[%s1648_s1 + $0x8c] ss:$16 sps:$4 sm:$0xff]  }
   0x7   :  { %594 = vmatpush1.bf16.msra.mxu0 %v1092_v6  ;;  %740 = vmatpush1.bf16.msra.mxu1 %v1093_v7  ;;  %v1110_v18 = vld [vmem:[%s1648_s1 + $0x80] ss:$16 sps:$4 sm:$0xff]   ;;  %v1111_v19 = vld [vmem:[%s1648_s1 + $0x88] ss:$16 sps:$4 sm:$0xff]   ;;  %v1112_v20 = vld [vmem:[%s1648_s1 + $0xa4] ss:$16 sps:$4 sm:$0xff]  }
   0x8   :  { %595 = vmatprep.subr.bf16.mxu0 %v1094_v8  ;;  %741 = vmatprep.subr.bf16.mxu1 %v1096_v9  ;;  %v1114_v21 = vld [vmem:[%s1648_s1 + $0xac] ss:$16 sps:$4 sm:$0xff]   ;;  %v1116_v22 = vld [vmem:[%s1648_s1 + $0xa0] ss:$16 sps:$4 sm:$0xff]   ;;  %v1117_v23 = vld [vmem:[%s1648_s1 + $0xa8] ss:$16 sps:$4 sm:$0xff]  }
   0x9   :  { %v1118_v24 = vld [vmem:[%s1648_s1 + $0xc4] ss:$16 sps:$4 sm:$0xff]   ;;  %v1120_v25 = vld [vmem:[%s1648_s1 + $0xcc] ss:$16 sps:$4 sm:$0xff]   ;;  %v1122_v26 = vld [vmem:[%s1648_s1 + $0xc0] ss:$16 sps:$4 sm:$0xff]  }
   0xa   :  { %v1123_v27 = vld [vmem:[%s1648_s1 + $0xc8] ss:$16 sps:$4 sm:$0xff]   ;;  %v1124_v28 = vld [vmem:[%s1648_s1 + $0xe4] ss:$16 sps:$4 sm:$0xff]   ;;  %v1126_v29 = vld [vmem:[%s1648_s1 + $0xec] ss:$16 sps:$4 sm:$0xff]  }
   0xb   :  { %596 = vmatpush1.bf16.msra.mxu0 %v1098_v10  ;;  %742 = vmatpush1.bf16.msra.mxu1 %v1099_v11  ;;  %v1128_v30 = vld [vmem:[%s1648_s1 + $0xe0] ss:$16 sps:$4 sm:$0xff]   ;;  %v1129_v31 = vld [vmem:[%s1648_s1 + $0xe8] ss:$16 sps:$4 sm:$0xff]   ;;  %v1130_v32 = vld [vmem:[%s1648_s1 + $0x104] ss:$16 sps:$4 sm:$0xff]  }
   0xc   :  { %597 = vmatprep.subr.bf16.mxu0 %v1100_v12  ;;  %743 = vmatprep.subr.bf16.mxu1 %v1102_v13  ;;  %v1132_v33 = vld [vmem:[%s1648_s1 + $0x10c] ss:$16 sps:$4 sm:$0xff]   ;;  %v1134_v34 = vld [vmem:[%s1648_s1 + $0x100] ss:$16 sps:$4 sm:$0xff]   ;;  %v1135_v35 = vld [vmem:[%s1648_s1 + $0x108] ss:$16 sps:$4 sm:$0xff]  }
   0xd   :  { %v1136_v36 = vld [vmem:[%s1648_s1 + $0x124] ss:$16 sps:$4 sm:$0xff]   ;;  %v1138_v37 = vld [vmem:[%s1648_s1 + $0x12c] ss:$16 sps:$4 sm:$0xff]   ;;  %v1140_v38 = vld [vmem:[%s1648_s1 + $0x120] ss:$16 sps:$4 sm:$0xff]  }
   0xe   :  { %v1141_v39 = vld [vmem:[%s1648_s1 + $0x128] ss:$16 sps:$4 sm:$0xff]   ;;  %v1142_v40 = vld [vmem:[%s1648_s1 + $0x144] ss:$16 sps:$4 sm:$0xff]   ;;  %v1144_v41 = vld [vmem:[%s1648_s1 + $0x14c] ss:$16 sps:$4 sm:$0xff]  }
   0xf   :  { %598 = vmatpush1.bf16.msra.mxu0 %v1104_v14  ;;  %744 = vmatpush1.bf16.msra.mxu1 %v1105_v15  ;;  %v1146_v42 = vld [vmem:[%s1648_s1 + $0x140] ss:$16 sps:$4 sm:$0xff]   ;;  %v1147_v43 = vld [vmem:[%s1648_s1 + $0x148] ss:$16 sps:$4 sm:$0xff]   ;;  %v1148_v44 = vld [vmem:[%s1648_s1 + $0x164] ss:$16 sps:$4 sm:$0xff]  }
  0x10   :  { %599 = vmatprep.subr.bf16.mxu0 %v1106_v16  ;;  %745 = vmatprep.subr.bf16.mxu1 %v1108_v17  ;;  %v1150_v45 = vld [vmem:[%s1648_s1 + $0x16c] ss:$16 sps:$4 sm:$0xff]   ;;  %v1152_v46 = vld [vmem:[%s1648_s1 + $0x160] ss:$16 sps:$4 sm:$0xff]   ;;  %v1153_v47 = vld [vmem:[%s1648_s1 + $0x168] ss:$16 sps:$4 sm:$0xff]  }
  0x11   :  { %v1180_v48 = vld [vmem:[%s1649_s0 + $0x4] ss:$12 sps:$4 sm:$0xff]   ;;  %v1156_v50 = vld [vmem:[%s1648_s1 + $0x18c] ss:$16 sps:$4 sm:$0xff]   ;;  %v1159_v52 = vld [vmem:[%s1648_s1 + $0x188] ss:$16 sps:$4 sm:$0xff]  }
  0x12   :  { %v1154_v49 = vld [vmem:[%s1648_s1 + $0x184] ss:$16 sps:$4 sm:$0xff]   ;;  %623 = vmatprep.mubr.bf16.mxu0 %v1180_v48  ;;  %769 = vmatprep.mubr.bf16.mxu1 %v1180_v48  ;;  %v1158_v51 = vld [vmem:[%s1648_s1 + $0x180] ss:$16 sps:$4 sm:$0xff]   ;;  %v1162_v54 = vld [vmem:[%s1648_s1 + $0x1ac] ss:$16 sps:$4 sm:$0xff]  }
  0x13   :  { %600 = vmatpush1.bf16.msra.mxu0 %v1110_v18  ;;  %746 = vmatpush1.bf16.msra.mxu1 %v1111_v19  ;;  %v1160_v53 = vld [vmem:[%s1648_s1 + $0x1a4] ss:$16 sps:$4 sm:$0xff]   ;;  %v1164_v55 = vld [vmem:[%s1648_s1 + $0x1a0] ss:$16 sps:$4 sm:$0xff]   ;;  %v1165_v56 = vld [vmem:[%s1648_s1 + $0x1a8] ss:$16 sps:$4 sm:$0xff]  }
  0x14   :  { %601 = vmatprep.subr.bf16.mxu0 %v1112_v20  ;;  %747 = vmatprep.subr.bf16.mxu1 %v1114_v21  ;;  %v1166_v57 = vld [vmem:[%s1648_s1 + $0x1c4] ss:$16 sps:$4 sm:$0xff]   ;;  %v1168_v58 = vld [vmem:[%s1648_s1 + $0x1cc] ss:$16 sps:$4 sm:$0xff]   ;;  %v1170_v59 = vld [vmem:[%s1648_s1 + $0x1c0] ss:$16 sps:$4 sm:$0xff]  }
  0x15   :  { %v1171_v60 = vld [vmem:[%s1648_s1 + $0x1c8] ss:$16 sps:$4 sm:$0xff]   ;;  %v1172_v61 = vld [vmem:[%s1648_s1 + $0x1e4] ss:$16 sps:$4 sm:$0xff]   ;;  %v1174_v62 = vld [vmem:[%s1648_s1 + $0x1ec] ss:$16 sps:$4 sm:$0xff]  }
  0x16   :  { %v1176_v63 = vld [vmem:[%s1648_s1 + $0x1e0] ss:$16 sps:$4 sm:$0xff]   ;;  %v1177_v0 = vld [vmem:[%s1648_s1 + $0x1e8] ss:$16 sps:$4 sm:$0xff]   ;;  %v1183_v1 = vld [vmem:[%s1648_s1 + $0x204] ss:$16 sps:$4 sm:$0xff]  }
  0x17   :  { %602 = vmatpush1.bf16.msra.mxu0 %v1116_v22  ;;  %748 = vmatpush1.bf16.msra.mxu1 %v1117_v23  ;;  %v1186_v2 = vld [vmem:[%s1648_s1 + $0x20c] ss:$16 sps:$4 sm:$0xff]   ;;  %v1181_v4 = vld [vmem:[%s1648_s1 + $0x200] ss:$16 sps:$4 sm:$0xff]   ;;  %v1184_v5 = vld [vmem:[%s1648_s1 + $0x208] ss:$16 sps:$4 sm:$0xff]  }
  0x18   :  { %603 = vmatprep.subr.bf16.mxu0 %v1118_v24  ;;  %749 = vmatprep.subr.bf16.mxu1 %v1120_v25  ;;  %v1178_v3 = vld [vmem:[%s1649_s0] ss:$12 sps:$4 sm:$0xff]   ;;  %v1187_v6 = vld [vmem:[%s1649_s0 + $0x1c] ss:$12 sps:$4 sm:$0xff]   ;;  %v1192_v7 = vld [vmem:[%s1648_s1 + $0x224] ss:$16 sps:$4 sm:$0xff]  }
  0x19   :  { %v1195_v8 = vld [vmem:[%s1648_s1 + $0x22c] ss:$16 sps:$4 sm:$0xff]   ;;  %v1190_v9 = vld [vmem:[%s1648_s1 + $0x220] ss:$16 sps:$4 sm:$0xff]   ;;  %v1193_v10 = vld [vmem:[%s1648_s1 + $0x228] ss:$16 sps:$4 sm:$0xff]  }
  0x1a   :  { %v1199_v11 = vld [vmem:[%s1648_s1 + $0x244] ss:$16 sps:$4 sm:$0x3f]   ;;  %v1201_v12 = vld [vmem:[%s1648_s1 + $0x24c] ss:$16 sps:$4 sm:$0x3f]  }
  0x1b   :  { %604 = vmatpush1.bf16.msra.mxu0 %v1122_v26  ;;  %750 = vmatpush1.bf16.msra.mxu1 %v1123_v27  ;;  %v1205_v13 = vld [vmem:[%s1648_s1 + $0x240] ss:$16 sps:$4 sm:$0x3f]   ;;  %v1206_v14 = vld [vmem:[%s1648_s1 + $0x248] ss:$16 sps:$4 sm:$0x3f]   ;;  %v109_v27 = vlaneseq }
  0x1c   :  { %605 = vmatprep.subr.bf16.mxu0 %v1124_v28  ;;  %751 = vmatprep.subr.bf16.mxu1 %v1126_v29  ;;  %v1189_v15 = vld [vmem:[%s1649_s0 + $0x18] ss:$12 sps:$4 sm:$0xff]   ;;  %v1196_v16 = vld [vmem:[%s1649_s0 + $0x34] ss:$12 sps:$4 sm:$0xff]   ;;  %v580_v17 = vsel %vm578_vm0, %v1205_v13, 0  ;;  %v586_v18 = vsel %vm578_vm0, %v1206_v14, 0 }
  0x1d   :  { %v1198_v19 = vld [vmem:[%s1649_s0 + $0x30] ss:$12 sps:$4 sm:$0xff]   ;;  %v1203_v20 = vld [vmem:[%s1649_s0 + $0x4c] ss:$12 sps:$4 sm:$0xff]   ;;  %v1207_v21 = vld [vmem:[%s1649_s0 + $0x48] ss:$12 sps:$4 sm:$0xff]  }
  0x1e   :  { %v1212_v22 = vmov 0   ;;  %v1208_v23 = vld [vmem:[%s1649_s0 + $0x8] ss:$12 sps:$4 sm:$0xff]   ;;  %v1209_v24 = vld [vmem:[%s1649_s0 + $0x20] ss:$12 sps:$4 sm:$0xff]   ;;  %v110_v28 = vshrl.u32 %v109_v27, 7 }
  0x1f   :  { %606 = vmatpush1.bf16.msra.mxu0 %v1128_v30  ;;  %752 = vmatpush1.bf16.msra.mxu1 %v1129_v31  ;;  %v1210_v25 = vld [vmem:[%s1649_s0 + $0x38] ss:$12 sps:$4 sm:$0xff]   ;;  %v1211_v26 = vld [vmem:[%s1649_s0 + $0x50] ss:$12 sps:$4 sm:$0xff]   ;;  %v107_v31 = vld [vmem:[%s1650_s2] sm:$0xf] }
  0x20   :  { %607 = vmatprep.subr.bf16.mxu0 %v1130_v32  ;;  %753 = vmatprep.subr.bf16.mxu1 %v1132_v33  ;;  %v111_v29 = vsub.s32 0, %v110_v28  ;;  %v119_v30 = vsub.s32 2, %v110_v28  ;;  %v115_v32 = vsub.s32 1, %v110_v28  ;;  %v123_v33 = vsub.s32 3, %v110_v28 }
  0x23   :  { %608 = vmatpush1.bf16.msra.mxu0 %v1134_v34  ;;  %754 = vmatpush1.bf16.msra.mxu1 %v1135_v35  ;;  %v1512_v34 = vrot.slane %v107_v31, %v111_v29  ;;  %v1514_v35 = vrot.slane %v107_v31, %v119_v30 }
  0x24   :  { %609 = vmatprep.subr.bf16.mxu0 %v1136_v36  ;;  %755 = vmatprep.subr.bf16.mxu1 %v1138_v37  ;;  %v1516_v36 = vrot.slane %v107_v31, %v115_v32  ;;  %v1518_v37 = vrot.slane %v107_v31, %v123_v33 }
  0x27   :  { %610 = vmatpush1.bf16.msra.mxu0 %v1140_v38  ;;  %756 = vmatpush1.bf16.msra.mxu1 %v1141_v39 }
  0x28   :  { %611 = vmatprep.subr.bf16.mxu0 %v1142_v40  ;;  %757 = vmatprep.subr.bf16.mxu1 %v1144_v41 }
  0x2b   :  { %612 = vmatpush1.bf16.msra.mxu0 %v1146_v42  ;;  %758 = vmatpush1.bf16.msra.mxu1 %v1147_v43 }
  0x2c   :  { %613 = vmatprep.subr.bf16.mxu0 %v1148_v44  ;;  %759 = vmatprep.subr.bf16.mxu1 %v1150_v45 }
  0x2f   :  { %614 = vmatpush1.bf16.msra.mxu0 %v1152_v46  ;;  %760 = vmatpush1.bf16.msra.mxu1 %v1153_v47 }
  0x30   :  { %615 = vmatprep.subr.bf16.mxu0 %v1154_v49  ;;  %761 = vmatprep.subr.bf16.mxu1 %v1156_v50 }
  0x33   :  { %616 = vmatpush1.bf16.msra.mxu0 %v1158_v51  ;;  %762 = vmatpush1.bf16.msra.mxu1 %v1159_v52 }
  0x34   :  { %617 = vmatprep.subr.bf16.mxu0 %v1160_v53  ;;  %763 = vmatprep.subr.bf16.mxu1 %v1162_v54 }
  0x37   :  { %618 = vmatpush1.bf16.msra.mxu0 %v1164_v55  ;;  %764 = vmatpush1.bf16.msra.mxu1 %v1165_v56 }
  0x38   :  { %619 = vmatprep.subr.bf16.mxu0 %v1166_v57  ;;  %765 = vmatprep.subr.bf16.mxu1 %v1168_v58 }
  0x3b   :  { %620 = vmatpush1.bf16.msra.mxu0 %v1170_v59  ;;  %766 = vmatpush1.bf16.msra.mxu1 %v1171_v60 }
  0x3c   :  { %621 = vmatprep.subr.bf16.mxu0 %v1172_v61  ;;  %767 = vmatprep.subr.bf16.mxu1 %v1174_v62 }
  0x3f   :  { %622 = vmatpush1.bf16.msra.mxu0 %v1176_v63  ;;  %768 = vmatpush1.bf16.msra.mxu1 %v1177_v0 }
  0x40   :  { %664 = vmatprep.subr.bf16.mxu0 %v1183_v1  ;;  %810 = vmatprep.subr.bf16.mxu1 %v1186_v2 }
  0x42   :  { %624 = vmatmul.mubr.bf16.vlgmr.msra.gmra.mrb[0].mxu0 %v1178_v3  ;;  %770 = vmatmul.mubr.bf16.vlgmr.msra.gmra.mrb[0].mxu1 %v1178_v3 }
  0x43   :  { %665 = vmatpush1.bf16.msra.mxu0 %v1181_v4  ;;  %811 = vmatpush1.bf16.msra.mxu1 %v1184_v5 }
  0x44   :  { %633 = vmatprep.mubr.bf16.mxu0 %v1187_v6  ;;  %779 = vmatprep.mubr.bf16.mxu1 %v1187_v6 }
  0x45   :  { %666 = vmatprep.subr.bf16.mxu0 %v1192_v7  ;;  %812 = vmatprep.subr.bf16.mxu1 %v1195_v8 }
  0x47   :  { %667 = vmatpush1.bf16.msra.mxu0 %v1190_v9  ;;  %813 = vmatpush1.bf16.msra.mxu1 %v1193_v10 }
  0x48   :  { %1007 = vmatprep.subr.msk.bf16.mxu0 %vm578_vm0, %v1199_v11  ;;  %1012 = vmatprep.subr.msk.bf16.mxu1 %vm578_vm0, %v1201_v12 }
  0x4a   :  { %634 = vmatmul.mubr.bf16.gmra.mrb[4].mxu0 %v1189_v15  ;;  %780 = vmatmul.mubr.bf16.gmra.mrb[4].mxu1 %v1189_v15 }
  0x4b   :  { %643 = vmatprep.mubr.bf16.mxu0 %v1196_v16  ;;  %789 = vmatprep.mubr.bf16.mxu1 %v1196_v16 }
  0x4c   :  { %669 = vmatpush1.bf16.msra.mxu0 %v580_v17  ;;  %815 = vmatpush1.bf16.msra.mxu1 %v586_v18 }
  0x52   :  { %644 = vmatmul.mubr.bf16.gmra.mrb[8].mxu0 %v1198_v19  ;;  %790 = vmatmul.mubr.bf16.gmra.mrb[8].mxu1 %v1198_v19 }
  0x53   :  { %653 = vmatprep.mubr.bf16.mxu0 %v1203_v20  ;;  %799 = vmatprep.mubr.bf16.mxu1 %v1203_v20 }
  0x5a   :  { %654 = vmatmul.mubr.bf16.gmra.mrb[12].mxu0 %v1207_v21  ;;  %800 = vmatmul.mubr.bf16.gmra.mrb[12].mxu1 %v1207_v21 }
  0x5b   :  { %696 = vmatprep.mubr.bf16.mxu0 %v1212_v22  ;;  %842 = vmatprep.mubr.bf16.mxu1 %v1212_v22 }
  0x62   :  { %1008 = vmatmul.mubr.msk.bf16.vlgmr.msra.gmra.mrb[0].mxu0 %vm565_vm1, %v1208_v23  ;;  %1013 = vmatmul.mubr.msk.bf16.vlgmr.msra.gmra.mrb[0].mxu1 %vm565_vm1, %v1208_v23 }
  0x63   :  { %706 = vmatprep.mubr.bf16.mxu0 %v1212_v22  ;;  %852 = vmatprep.mubr.bf16.mxu1 %v1212_v22 }
  0x6a   :  { %1009 = vmatmul.mubr.msk.bf16.gmra.mrb[4].mxu0 %vm565_vm1, %v1209_v24  ;;  %1014 = vmatmul.mubr.msk.bf16.gmra.mrb[4].mxu1 %vm565_vm1, %v1209_v24 }
  0x6b   :  { %716 = vmatprep.mubr.bf16.mxu0 %v1212_v22  ;;  %862 = vmatprep.mubr.bf16.mxu1 %v1212_v22 }
  0x72   :  { %1010 = vmatmul.mubr.msk.bf16.gmra.mrb[8].mxu0 %vm565_vm1, %v1210_v25  ;;  %1015 = vmatmul.mubr.msk.bf16.gmra.mrb[8].mxu1 %vm565_vm1, %v1210_v25 }
  0x73   :  { %726 = vmatprep.mubr.bf16.mxu0 %v1212_v22  ;;  %872 = vmatprep.mubr.bf16.mxu1 %v1212_v22 }
  0x7a   :  { %1011 = vmatmul.mubr.msk.bf16.gmra.mrb[12].mxu0 %vm565_vm1, %v1211_v26  ;;  %1016 = vmatmul.mubr.msk.bf16.gmra.mrb[12].mxu1 %vm565_vm1, %v1211_v26 }
 0x135   :  { %v698_v38 = vpop.f32.mrb[0].mxu0  ;;  %v844_v39 = vpop.f32.mrb[0].mxu1 }
 0x136   :  { %v1017_v40 = vadd.f32 %v698_v38, %v1512_v34  ;;  %v1033_v41 = vadd.f32 %v844_v39, %v1514_v35  ;;  %v700_v42 = vpop.f32.mrb[1].mxu0  ;;  %v846_v43 = vpop.f32.mrb[1].mxu1 }
 0x137   :  { %v1018_v44 = vadd.f32 %v700_v42, %v1516_v36  ;;  %v1034_v45 = vadd.f32 %v846_v43, %v1518_v37  ;;  %v702_v46 = vpop.f32.mrb[2].mxu0  ;;  %v848_v47 = vpop.f32.mrb[2].mxu1 }
 0x138   :  { %883 = vst [vmem:[%s1651_s3] sm:$0xff] %v1017_v40  ;;  %885 = vst [vmem:[%s1651_s3 + $0x10] sm:$0xff] %v1033_v41  ;;  %v1019_v48 = vadd.f32 %v702_v46, %v1512_v34  ;;  %v1035_v49 = vadd.f32 %v848_v47, %v1514_v35  ;;  %v704_v50 = vpop.f32.mrb[3].mxu0  ;;  %v850_v51 = vpop.f32.mrb[3].mxu1 }
 0x139   :  { %884 = vst [vmem:[%s1651_s3 + $0x8] sm:$0xff] %v1018_v44  ;;  %886 = vst [vmem:[%s1651_s3 + $0x18] sm:$0xff] %v1034_v45  ;;  %v1020_v52 = vadd.f32 %v704_v50, %v1516_v36  ;;  %v1036_v53 = vadd.f32 %v850_v51, %v1518_v37 }
 0x13a   :  { %887 = vst [vmem:[%s1651_s3 + $0x20] sm:$0xff] %v1019_v48  ;;  %889 = vst [vmem:[%s1651_s3 + $0x30] sm:$0xff] %v1035_v49 }
 0x13b   :  { %888 = vst [vmem:[%s1651_s3 + $0x28] sm:$0xff] %v1020_v52  ;;  %890 = vst [vmem:[%s1651_s3 + $0x38] sm:$0xff] %v1036_v53 }
 0x13d   :  { %v708_v54 = vpop.f32.mrb[4].mxu0  ;;  %v854_v55 = vpop.f32.mrb[4].mxu1 }
 0x13e   :  { %v1021_v56 = vadd.f32 %v708_v54, %v1512_v34  ;;  %v1037_v57 = vadd.f32 %v854_v55, %v1514_v35  ;;  %v710_v58 = vpop.f32.mrb[5].mxu0  ;;  %v856_v59 = vpop.f32.mrb[5].mxu1 }
 0x13f   :  { %v1022_v60 = vadd.f32 %v710_v58, %v1516_v36  ;;  %v1038_v61 = vadd.f32 %v856_v59, %v1518_v37  ;;  %v712_v62 = vpop.f32.mrb[6].mxu0  ;;  %v858_v63 = vpop.f32.mrb[6].mxu1 }
 0x140   :  { %891 = vst [vmem:[%s1651_s3 + $0x40] sm:$0xff] %v1021_v56  ;;  %893 = vst [vmem:[%s1651_s3 + $0x50] sm:$0xff] %v1037_v57  ;;  %v1023_v0 = vadd.f32 %v712_v62, %v1512_v34  ;;  %v1039_v1 = vadd.f32 %v858_v63, %v1514_v35  ;;  %v714_v2 = vpop.f32.mrb[7].mxu0  ;;  %v860_v3 = vpop.f32.mrb[7].mxu1 }
 0x141   :  { %892 = vst [vmem:[%s1651_s3 + $0x48] sm:$0xff] %v1022_v60  ;;  %894 = vst [vmem:[%s1651_s3 + $0x58] sm:$0xff] %v1038_v61  ;;  %v1024_v4 = vadd.f32 %v714_v2, %v1516_v36  ;;  %v1040_v5 = vadd.f32 %v860_v3, %v1518_v37 }
 0x142   :  { %895 = vst [vmem:[%s1651_s3 + $0x60] sm:$0xff] %v1023_v0  ;;  %897 = vst [vmem:[%s1651_s3 + $0x70] sm:$0xff] %v1039_v1 }
 0x143   :  { %896 = vst [vmem:[%s1651_s3 + $0x68] sm:$0xff] %v1024_v4  ;;  %898 = vst [vmem:[%s1651_s3 + $0x78] sm:$0xff] %v1040_v5 }
 0x145   :  { %v718_v6 = vpop.f32.mrb[8].mxu0  ;;  %v864_v7 = vpop.f32.mrb[8].mxu1 }
 0x146   :  { %v1025_v8 = vadd.f32 %v718_v6, %v1512_v34  ;;  %v1041_v9 = vadd.f32 %v864_v7, %v1514_v35  ;;  %v720_v10 = vpop.f32.mrb[9].mxu0  ;;  %v866_v11 = vpop.f32.mrb[9].mxu1 }
 0x147   :  { %v1026_v12 = vadd.f32 %v720_v10, %v1516_v36  ;;  %v1042_v13 = vadd.f32 %v866_v11, %v1518_v37  ;;  %v722_v14 = vpop.f32.mrb[10].mxu0  ;;  %v868_v15 = vpop.f32.mrb[10].mxu1 }
 0x148   :  { %899 = vst [vmem:[%s1651_s3 + $0x80] sm:$0xff] %v1025_v8  ;;  %901 = vst [vmem:[%s1651_s3 + $0x90] sm:$0xff] %v1041_v9  ;;  %v1027_v16 = vadd.f32 %v722_v14, %v1512_v34  ;;  %v1043_v17 = vadd.f32 %v868_v15, %v1514_v35  ;;  %v724_v18 = vpop.f32.mrb[11].mxu0  ;;  %v870_v19 = vpop.f32.mrb[11].mxu1 }
 0x149   :  { %900 = vst [vmem:[%s1651_s3 + $0x88] sm:$0xff] %v1026_v12  ;;  %902 = vst [vmem:[%s1651_s3 + $0x98] sm:$0xff] %v1042_v13  ;;  %v1028_v20 = vadd.f32 %v724_v18, %v1516_v36  ;;  %v1044_v21 = vadd.f32 %v870_v19, %v1518_v37 }
 0x14a   :  { %903 = vst [vmem:[%s1651_s3 + $0xa0] sm:$0xff] %v1027_v16  ;;  %905 = vst [vmem:[%s1651_s3 + $0xb0] sm:$0xff] %v1043_v17 }
 0x14b   :  { %904 = vst [vmem:[%s1651_s3 + $0xa8] sm:$0xff] %v1028_v20  ;;  %906 = vst [vmem:[%s1651_s3 + $0xb8] sm:$0xff] %v1044_v21 }
 0x14d   :  { %v728_v22 = vpop.f32.mrb[12].mxu0  ;;  %v874_v23 = vpop.f32.mrb[12].mxu1 }
 0x14e   :  { %v1029_v24 = vadd.f32 %v728_v22, %v1512_v34  ;;  %v1045_v25 = vadd.f32 %v874_v23, %v1514_v35  ;;  %v730_v26 = vpop.f32.mrb[13].mxu0  ;;  %v876_v27 = vpop.f32.mrb[13].mxu1 }
 0x14f   :  { %v1030_v28 = vadd.f32 %v730_v26, %v1516_v36  ;;  %v1046_v29 = vadd.f32 %v876_v27, %v1518_v37  ;;  %v732_v30 = vpop.f32.mrb[14].mxu0  ;;  %v878_v31 = vpop.f32.mrb[14].mxu1 }
 0x150   :  { %907 = vst [vmem:[%s1651_s3 + $0xc0] sm:$0xff] %v1029_v24  ;;  %909 = vst [vmem:[%s1651_s3 + $0xd0] sm:$0xff] %v1045_v25  ;;  %v1031_v32 = vadd.f32 %v732_v30, %v1512_v34  ;;  %v1047_v33 = vadd.f32 %v878_v31, %v1514_v35  ;;  %v734_v38 = vpop.f32.mrb[15].mxu0  ;;  %v880_v39 = vpop.f32.mrb[15].mxu1 }
 0x151   :  { %908 = vst [vmem:[%s1651_s3 + $0xc8] sm:$0xff] %v1030_v28  ;;  %910 = vst [vmem:[%s1651_s3 + $0xd8] sm:$0xff] %v1046_v29  ;;  %v1032_v40 = vadd.f32 %v734_v38, %v1516_v36  ;;  %v1048_v41 = vadd.f32 %v880_v39, %v1518_v37 }
 0x152   :  { %911 = vst [vmem:[%s1651_s3 + $0xe0] sm:$0xff] %v1031_v32  ;;  %913 = vst [vmem:[%s1651_s3 + $0xf0] sm:$0xff] %v1047_v33 }
 0x153   :  { %912 = vst [vmem:[%s1651_s3 + $0xe8] sm:$0xff] %v1032_v40  ;;  %914 = vst [vmem:[%s1651_s3 + $0xf8] sm:$0xff] %v1048_v41 }

// kernel: rnn_forward.3
= control target key start
LH: loop header
LB: loop body
LE: loop exit
PB: predicated region body
PF: predicated region fallthrough
CT: control target
= control target key end

     0   :  { %12 = vsyncpa [#allocation7], 0  ;;  %s1808_s24 = smov 0   ;;  %s2184_s0 = inlined_call_operand.vmem [shape: f32[8,8,512], index: 0, kind: input, shape index: {}]   ;;  %s2185_s1 = inlined_call_operand.vmem [shape: bf16[128,512], index: 1, kind: input, shape index: {}]   ;;  %s2186_s2 = inlined_call_operand.vmem [shape: bf16[128,512], index: 2, kind: input, shape index: {}]   ;;  %s2187_s3 = inlined_call_operand.vmem [shape: bf16[128,512], index: 3, kind: input, shape index: {}]   ;;  %s2188_s4 = inlined_call_operand.vmem [shape: f32[1,512], index: 4, kind: input, shape index: {}]   ;;  %s2189_s5 = inlined_call_operand.vmem [shape: bf16[128,6], index: 5, kind: input, shape index: {}]   ;;  %s2190_s6 = inlined_call_operand.vmem [shape: f32[1,6], index: 6, kind: input, shape index: {}]   ;;  %s2191_s7 = inlined_call_operand.hbm [shape: f32[8,6], index: 7, kind: output, shape index: {}]  }
   0x1 LB: > { %s1814_s25 = sadd.s32 4294967295, %s1761_s24   ;;  %p1368_p0 = scmp.ge.s32.totalorder %s1761_s24, 1  ;;  %s1761_s24 = sphi %s1808_s24, %s18_s24  }
   0x2   : > { %p233_p1 = scmp.lt.s32.totalorder %s1761_s24, 9 }
   0x4   : > { %p234_p2 = pnand %p1368_p0, %p233_p1 }
   0x5   : > { %p260_p3 = scmp.lt.s32.totalorder (!%p234_p2), %s1814_s25, 7  ;;  %p1371_p4 = scmp.ne.s32.totalorder (!%p234_p2), %s1814_s25, 0 }
   0x6   : > { %237 = sbr.rel (%p234_p2) target bundleno = 1133 (0x46d), region = 48 }
   0xd   : > { %s261_s26 = scalar_select %p260_p3, %s1814_s25, 7 }
   0xe   : > { %269 = sbr.rel (%p1371_p4) target bundleno = 21 (0x15), region = 52  ;;  %v1763_v0 = vmov (!%p1371_p4), 0.0  }
   0xf   : > { %s1488_s27 = sshll.u32 %s261_s26, 5  ;;  %270 = vst [vmem:[#allocation2] sm:$0xff] (!%p1371_p4), %v1763_v0  ;;  %271 = vst [vmem:[#allocation3] sm:$0xff] (!%p1371_p4), %v1763_v0 }
  0x10   : > { %s1823_s30 = scalar_lea.vmem %s2184_s0, %s1488_s27  ;;  %272 = vst [vmem:[#allocation4] sm:$0xff] (!%p1371_p4), %v1763_v0  ;;  %273 = vst [vmem:[#allocation5] sm:$0xff] (!%p1371_p4), %v1763_v0 }
  0x15 PF: > { %v1537_v1 = vld [vmem:[%s2185_s1 + $0x4] ss:$16 sps:$4 sm:$0xff]   ;;  %v1539_v2 = vld [vmem:[%s2185_s1] ss:$16 sps:$4 sm:$0xff]   ;;  %v1764_v3 = vmov 0   ;;  %p1474_p5 = scmp.ne.s32.totalorder %s1814_s25, 7 }
  0x16   : > { %504 = vmatprep.mubr.bf16.mxu0 %v1764_v3  ;;  %545 = vmatprep.mubr.bf16.mxu1 %v1764_v3  ;;  %v1540_v4 = vld [vmem:[%s2185_s1 + $0x24] ss:$16 sps:$4 sm:$0xff]   ;;  %v1542_v5 = vld [vmem:[%s2185_s1 + $0x20] ss:$16 sps:$4 sm:$0xff]   ;;  %v1548_v7 = vld [vmem:[%s2185_s1 + $0xc] ss:$16 sps:$4 sm:$0xff]  }
  0x17   : > { %472 = vmatprep.subr.bf16.mxu0 %v1537_v1  ;;  %v1543_v6 = vld [vmem:[%s2185_s1 + $0x44] ss:$16 sps:$4 sm:$0xff]   ;;  %v1551_v8 = vld [vmem:[%s2185_s1 + $0x8] ss:$16 sps:$4 sm:$0xff]   ;;  %v1545_v9 = vld [vmem:[%s2185_s1 + $0x40] ss:$16 sps:$4 sm:$0xff]   ;;  %513 = vmatprep.subr.bf16.mxu1 %v1548_v7 }
  0x18   : > { %473 = vmatpush1.bf16.msra.mxu0 %v1539_v2  ;;  %v1546_v10 = vld [vmem:[%s2185_s1 + $0x64] ss:$16 sps:$4 sm:$0xff]   ;;  %514 = vmatpush1.bf16.msra.mxu1 %v1551_v8  ;;  %v1554_v11 = vld [vmem:[%s2185_s1 + $0x2c] ss:$16 sps:$4 sm:$0xff]   ;;  %v1557_v12 = vld [vmem:[%s2185_s1 + $0x28] ss:$16 sps:$4 sm:$0xff]  }
  0x19   : > { %474 = vmatprep.subr.bf16.mxu0 %v1540_v4  ;;  %515 = vmatprep.subr.bf16.mxu1 %v1554_v11  ;;  %v1550_v13 = vld [vmem:[%s2185_s1 + $0x60] ss:$16 sps:$4 sm:$0xff]   ;;  %v1552_v14 = vld [vmem:[%s2185_s1 + $0x84] ss:$16 sps:$4 sm:$0xff]   ;;  %v1560_v15 = vld [vmem:[%s2185_s1 + $0x4c] ss:$16 sps:$4 sm:$0xff]  }
  0x1a   : > { %v1563_v16 = vld [vmem:[%s2185_s1 + $0x48] ss:$16 sps:$4 sm:$0xff]   ;;  %v1566_v17 = vld [vmem:[%s2185_s1 + $0x6c] ss:$16 sps:$4 sm:$0xff]   ;;  %v1556_v18 = vld [vmem:[%s2185_s1 + $0x80] ss:$16 sps:$4 sm:$0xff]  }
  0x1b   : > { %v1558_v19 = vld [vmem:[%s2185_s1 + $0xa4] ss:$16 sps:$4 sm:$0xff]   ;;  %v1569_v20 = vld [vmem:[%s2185_s1 + $0x68] ss:$16 sps:$4 sm:$0xff]   ;;  %v1572_v21 = vld [vmem:[%s2185_s1 + $0x8c] ss:$16 sps:$4 sm:$0xff]  }
  0x1c   : > { %475 = vmatpush1.bf16.msra.mxu0 %v1542_v5  ;;  %516 = vmatpush1.bf16.msra.mxu1 %v1557_v12  ;;  %v1562_v22 = vld [vmem:[%s2185_s1 + $0xa0] ss:$16 sps:$4 sm:$0xff]   ;;  %v1564_v23 = vld [vmem:[%s2185_s1 + $0xc4] ss:$16 sps:$4 sm:$0xff]   ;;  %v1575_v24 = vld [vmem:[%s2185_s1 + $0x88] ss:$16 sps:$4 sm:$0xff]  }
  0x1d   : > { %476 = vmatprep.subr.bf16.mxu0 %v1543_v6  ;;  %517 = vmatprep.subr.bf16.mxu1 %v1560_v15  ;;  %v1576_v25 = vld [vmem:[%s2185_s1 + $0xac] ss:$16 sps:$4 sm:$0xff]   ;;  %v1568_v26 = vld [vmem:[%s2185_s1 + $0xc0] ss:$16 sps:$4 sm:$0xff]   ;;  %v1570_v27 = vld [vmem:[%s2185_s1 + $0xe4] ss:$16 sps:$4 sm:$0xff]  }
  0x1e   : > { %v1578_v28 = vld [vmem:[%s2185_s1 + $0xa8] ss:$16 sps:$4 sm:$0xff]   ;;  %v1579_v29 = vld [vmem:[%s2185_s1 + $0xcc] ss:$16 sps:$4 sm:$0xff]   ;;  %v1574_v30 = vld [vmem:[%s2185_s1 + $0xe0] ss:$16 sps:$4 sm:$0xff]  }
  0x1f   : > { %v278_v31 = vld [vmem:[#allocation2] sm:$0xff]  ;;  %v1581_v32 = vld [vmem:[%s2185_s1 + $0xc8] ss:$16 sps:$4 sm:$0xff]   ;;  %v1582_v34 = vld [vmem:[%s2185_s1 + $0xec] ss:$16 sps:$4 sm:$0xff]   ;;  %vm1766_vm0 = vmmov (!%p1474_p5), 0  }
  0x20   : > { %477 = vmatpush1.bf16.msra.mxu0 %v1545_v9  ;;  %518 = vmatpush1.bf16.msra.mxu1 %v1563_v16  ;;  %v1587_v33 = vld [vmem:[%s2187_s3 + $0x4] ss:$16 sps:$4 sm:$0xff]   ;;  %v279_v35 = vpack.c.bf16 %v278_v31, %v278_v31  ;;  %v1584_v36 = vld [vmem:[%s2185_s1 + $0xe8] ss:$16 sps:$4 sm:$0xff]   ;;  %v1585_v37 = vld [vmem:[%s2187_s3] ss:$16 sps:$4 sm:$0xff]  }
  0x21   : > { %478 = vmatprep.subr.bf16.mxu0 %v1546_v10  ;;  %519 = vmatprep.subr.bf16.mxu1 %v1566_v17  ;;  %v1593_v38 = vld [vmem:[%s2187_s3 + $0x24] ss:$16 sps:$4 sm:$0xff]   ;;  %v1590_v39 = vld [vmem:[%s2187_s3 + $0xc] ss:$16 sps:$4 sm:$0xff]   ;;  %v1591_v40 = vld [vmem:[%s2187_s3 + $0x20] ss:$16 sps:$4 sm:$0xff]  }
  0x22   : > { %v1588_v41 = vld [vmem:[%s2187_s3 + $0x8] ss:$16 sps:$4 sm:$0xff]   ;;  %v1599_v42 = vld [vmem:[%s2187_s3 + $0x44] ss:$16 sps:$4 sm:$0xff]   ;;  %v1596_v43 = vld [vmem:[%s2187_s3 + $0x2c] ss:$16 sps:$4 sm:$0xff]  }
  0x23   : > { %v1597_v44 = vld [vmem:[%s2187_s3 + $0x40] ss:$16 sps:$4 sm:$0xff]   ;;  %v1594_v45 = vld [vmem:[%s2187_s3 + $0x28] ss:$16 sps:$4 sm:$0xff]   ;;  %v1605_v46 = vld [vmem:[%s2187_s3 + $0x64] ss:$16 sps:$4 sm:$0xff]  }
  0x24   : > { %479 = vmatpush1.bf16.msra.mxu0 %v1550_v13  ;;  %520 = vmatpush1.bf16.msra.mxu1 %v1569_v20  ;;  %v1602_v47 = vld [vmem:[%s2187_s3 + $0x4c] ss:$16 sps:$4 sm:$0xff]   ;;  %v1603_v48 = vld [vmem:[%s2187_s3 + $0x60] ss:$16 sps:$4 sm:$0xff]   ;;  %v1600_v49 = vld [vmem:[%s2187_s3 + $0x48] ss:$16 sps:$4 sm:$0xff]  }
  0x25   : > { %480 = vmatprep.subr.bf16.mxu0 %v1552_v14  ;;  %521 = vmatprep.subr.bf16.mxu1 %v1572_v21  ;;  %v1611_v50 = vld [vmem:[%s2187_s3 + $0x84] ss:$16 sps:$4 sm:$0xff]   ;;  %v1608_v51 = vld [vmem:[%s2187_s3 + $0x6c] ss:$16 sps:$4 sm:$0xff]   ;;  %v1609_v52 = vld [vmem:[%s2187_s3 + $0x80] ss:$16 sps:$4 sm:$0xff]  }
  0x26   : > { %v1606_v53 = vld [vmem:[%s2187_s3 + $0x68] ss:$16 sps:$4 sm:$0xff]   ;;  %v1614_v54 = vld [vmem:[%s2187_s3 + $0x8c] ss:$16 sps:$4 sm:$0xff]   ;;  %v1617_v56 = vld [vmem:[%s2187_s3 + $0xa4] ss:$16 sps:$4 sm:$0xff]  }
  0x27   : > { %v1612_v55 = vld [vmem:[%s2187_s3 + $0x88] ss:$16 sps:$4 sm:$0xff]   ;;  %v1615_v57 = vld [vmem:[%s2187_s3 + $0xa0] ss:$16 sps:$4 sm:$0xff]   ;;  %v1620_v58 = vld [vmem:[%s2187_s3 + $0xac] ss:$16 sps:$4 sm:$0xff]  }
  0x28   : > { %481 = vmatpush1.bf16.msra.mxu0 %v1556_v18  ;;  %522 = vmatpush1.bf16.msra.mxu1 %v1575_v24  ;;  %v1618_v59 = vld [vmem:[%s2187_s3 + $0xa8] ss:$16 sps:$4 sm:$0xff]   ;;  %v1623_v60 = vld [vmem:[%s2187_s3 + $0xc4] ss:$16 sps:$4 sm:$0xff]   ;;  %v1621_v61 = vld [vmem:[%s2187_s3 + $0xc0] ss:$16 sps:$4 sm:$0xff]  }
  0x29   : > { %482 = vmatprep.subr.bf16.mxu0 %v1558_v19  ;;  %523 = vmatprep.subr.bf16.mxu1 %v1576_v25  ;;  %v1626_v62 = vld [vmem:[%s2187_s3 + $0xcc] ss:$16 sps:$4 sm:$0xff]   ;;  %v1624_v63 = vld [vmem:[%s2187_s3 + $0xc8] ss:$16 sps:$4 sm:$0xff]   ;;  %v1629_v0 = vld [vmem:[%s2187_s3 + $0xe4] ss:$16 sps:$4 sm:$0xff]  }
  0x2a   : > { %v1627_v1 = vld [vmem:[%s2187_s3 + $0xe0] ss:$16 sps:$4 sm:$0xff]   ;;  %v1632_v2 = vld [vmem:[%s2187_s3 + $0xec] ss:$16 sps:$4 sm:$0xff]   ;;  %v1630_v4 = vld [vmem:[%s2187_s3 + $0xe8] ss:$16 sps:$4 sm:$0xff]  }
  0x2b   : > { %v618_v5 = vld [vmem:[#allocation4] sm:$0xff]  ;;  %v1636_v9 = vld [vmem:[%s2186_s2 + $0x8] ss:$16 sps:$4 sm:$0xff]   ;;  %v1638_v10 = vld [vmem:[%s2186_s2 + $0xc] ss:$16 sps:$4 sm:$0xff]   ;;  %vm1305_vm1 = vcmask (!%p1474_p5), 48128  }
  0x2c   : > { %483 = vmatpush1.bf16.msra.mxu0 %v1562_v22  ;;  %524 = vmatpush1.bf16.msra.mxu1 %v1578_v28  ;;  %v619_v6 = vpack.c.bf16 %v618_v5, %v618_v5  ;;  %v1635_v7 = vld [vmem:[%s2186_s2 + $0x4] ss:$16 sps:$4 sm:$0xff]   ;;  %v1633_v8 = vld [vmem:[%s2186_s2] ss:$16 sps:$4 sm:$0xff]   ;;  %v1644_v12 = vld [vmem:[%s2186_s2 + $0x2c] ss:$16 sps:$4 sm:$0xff]  }
  0x2d   : > { %484 = vmatprep.subr.bf16.mxu0 %v1564_v23  ;;  %525 = vmatprep.subr.bf16.mxu1 %v1579_v29  ;;  %v1641_v11 = vld [vmem:[%s2186_s2 + $0x24] ss:$16 sps:$4 sm:$0xff]   ;;  %v1639_v13 = vld [vmem:[%s2186_s2 + $0x20] ss:$16 sps:$4 sm:$0xff]   ;;  %v1642_v14 = vld [vmem:[%s2186_s2 + $0x28] ss:$16 sps:$4 sm:$0xff]  }
  0x2e   : > { %v1647_v15 = vld [vmem:[%s2186_s2 + $0x44] ss:$16 sps:$4 sm:$0xff]   ;;  %v1645_v16 = vld [vmem:[%s2186_s2 + $0x40] ss:$16 sps:$4 sm:$0xff]   ;;  %v1648_v17 = vld [vmem:[%s2186_s2 + $0x48] ss:$16 sps:$4 sm:$0xff]  }
  0x2f   : > { %v1653_v18 = vld [vmem:[%s2186_s2 + $0x64] ss:$16 sps:$4 sm:$0xff]   ;;  %v1656_v19 = vld [vmem:[%s2186_s2 + $0x6c] ss:$16 sps:$4 sm:$0xff]   ;;  %v1651_v20 = vld [vmem:[%s2186_s2 + $0x60] ss:$16 sps:$4 sm:$0xff]  }
  0x30   : > { %485 = vmatpush1.bf16.msra.mxu0 %v1568_v26  ;;  %526 = vmatpush1.bf16.msra.mxu1 %v1581_v32  ;;  %v1654_v21 = vld [vmem:[%s2186_s2 + $0x68] ss:$16 sps:$4 sm:$0xff]   ;;  %v1659_v22 = vld [vmem:[%s2186_s2 + $0x84] ss:$16 sps:$4 sm:$0xff]   ;;  %v1662_v23 = vld [vmem:[%s2186_s2 + $0x8c] ss:$16 sps:$4 sm:$0xff]  }
  0x31   : > { %486 = vmatprep.subr.bf16.mxu0 %v1570_v27  ;;  %527 = vmatprep.subr.bf16.mxu1 %v1582_v34  ;;  %v1657_v24 = vld [vmem:[%s2186_s2 + $0x80] ss:$16 sps:$4 sm:$0xff]   ;;  %v1660_v25 = vld [vmem:[%s2186_s2 + $0x88] ss:$16 sps:$4 sm:$0xff]   ;;  %v1665_v27 = vld [vmem:[%s2186_s2 + $0xa4] ss:$16 sps:$4 sm:$0xff]  }
  0x32   : > { %v1663_v26 = vld [vmem:[%s2186_s2 + $0xa0] ss:$16 sps:$4 sm:$0xff]   ;;  %v1666_v28 = vld [vmem:[%s2186_s2 + $0xa8] ss:$16 sps:$4 sm:$0xff]   ;;  %v1668_v29 = vld [vmem:[%s2186_s2 + $0xac] ss:$16 sps:$4 sm:$0xff]  }
  0x33   : > { %v1674_v31 = vld [vmem:[%s2186_s2 + $0xcc] ss:$16 sps:$4 sm:$0xff]   ;;  %v1669_v32 = vld [vmem:[%s2186_s2 + $0xc0] ss:$16 sps:$4 sm:$0xff]   ;;  %v1677_v34 = vld [vmem:[%s2186_s2 + $0xe4] ss:$16 sps:$4 sm:$0xff]  }
  0x34   : > { %487 = vmatpush1.bf16.msra.mxu0 %v1574_v30  ;;  %528 = vmatpush1.bf16.msra.mxu1 %v1584_v36  ;;  %v1671_v30 = vld [vmem:[%s2186_s2 + $0xc4] ss:$16 sps:$4 sm:$0xff]   ;;  %v1675_v36 = vld [vmem:[%s2186_s2 + $0xe0] ss:$16 sps:$4 sm:$0xff]  }
  0x35   : > { %812 = vmatprep.subr.bf16.mxu0 %v1587_v33  ;;  %853 = vmatprep.subr.bf16.mxu1 %v1590_v39  ;;  %v1672_v33 = vld [vmem:[%s2186_s2 + $0xc8] ss:$16 sps:$4 sm:$0xff]  }
  0x36   : > { %v275_v39 = vld [vmem:[%s1823_s30 + $0x8] sm:$0xff] }
  0x37   : > { %505 = vmatmul.mubr.bf16.vlgmr.msra.gmra.mrb[0].mxu0 %v279_v35  ;;  %546 = vmatmul.mubr.bf16.vlgmr.msra.gmra.mrb[0].mxu1 %v279_v35  ;;  %v1680_v35 = vld [vmem:[%s2186_s2 + $0xec] ss:$16 sps:$4 sm:$0xff]  }
  0x38   : > { %813 = vmatpush1.bf16.msra.mxu0 %v1585_v37  ;;  %844 = vmatprep.mubr.bf16.mxu0 %v1764_v3  ;;  %v1678_v37 = vld [vmem:[%s2186_s2 + $0xe8] ss:$16 sps:$4 sm:$0xff]  }
  0x39   : > { %814 = vmatprep.subr.bf16.mxu0 %v1593_v38  ;;  %854 = vmatpush1.bf16.msra.mxu1 %v1588_v41  ;;  %v274_v38 = vld [vmem:[%s1823_s30] sm:$0xff] }
  0x3a   : > { %855 = vmatprep.subr.bf16.mxu1 %v1596_v43  ;;  %885 = vmatprep.mubr.bf16.mxu1 %v1764_v3 }
  0x3c   : > { %815 = vmatpush1.bf16.msra.mxu0 %v1591_v40 }
  0x3d   : > { %816 = vmatprep.subr.bf16.mxu0 %v1599_v42  ;;  %856 = vmatpush1.bf16.msra.mxu1 %v1594_v45 }
  0x3e   : > { %857 = vmatprep.subr.bf16.mxu1 %v1602_v47 }
  0x40   : > { %817 = vmatpush1.bf16.msra.mxu0 %v1597_v44 }
  0x41   : > { %818 = vmatprep.subr.bf16.mxu0 %v1605_v46  ;;  %858 = vmatpush1.bf16.msra.mxu1 %v1600_v49 }
  0x42   : > { %859 = vmatprep.subr.bf16.mxu1 %v1608_v51 }
  0x44   : > { %819 = vmatpush1.bf16.msra.mxu0 %v1603_v48  ;;  %v277_v48 = vld [vmem:[%s1823_s30 + $0x18] sm:$0xff] }
  0x45   : > { %820 = vmatprep.subr.bf16.mxu0 %v1611_v50  ;;  %860 = vmatpush1.bf16.msra.mxu1 %v1606_v53 }
  0x46   : > { %861 = vmatprep.subr.bf16.mxu1 %v1614_v54  ;;  %v276_v54 = vld [vmem:[%s1823_s30 + $0x10] sm:$0xff] }
  0x48   : > { %821 = vmatpush1.bf16.msra.mxu0 %v1609_v52 }
  0x49   : > { %862 = vmatpush1.bf16.msra.mxu1 %v1612_v55  ;;  %822 = vmatprep.subr.bf16.mxu0 %v1617_v56 }
  0x4a   : > { %863 = vmatprep.subr.bf16.mxu1 %v1620_v58 }
  0x4c   : > { %823 = vmatpush1.bf16.msra.mxu0 %v1615_v57 }
  0x4d   : > { %864 = vmatpush1.bf16.msra.mxu1 %v1618_v59  ;;  %824 = vmatprep.subr.bf16.mxu0 %v1623_v60 }
  0x4e   : > { %865 = vmatprep.subr.bf16.mxu1 %v1626_v62 }
  0x50   : > { %825 = vmatpush1.bf16.msra.mxu0 %v1621_v61 }
  0x51   : > { %866 = vmatpush1.bf16.msra.mxu1 %v1624_v63  ;;  %826 = vmatprep.subr.bf16.mxu0 %v1629_v0  ;;  %v558_v63 = vld [vmem:[#allocation3] sm:$0xff] }
  0x52   : > { %867 = vmatprep.subr.bf16.mxu1 %v1632_v2 }
  0x54   : > { %827 = vmatpush1.bf16.msra.mxu0 %v1627_v1 }
  0x55   : > { %868 = vmatpush1.bf16.msra.mxu1 %v1630_v4  ;;  %1054 = vmatprep.subr.bf16.mxu0 %v1635_v7 }
  0x56   : > { %1095 = vmatprep.subr.bf16.mxu1 %v1638_v10 }
  0x57   : > { %845 = vmatmul.mubr.bf16.vlgmr.msra.gmra.mrb[4].mxu0 %v619_v6 }
  0x58   : > { %1086 = vmatprep.mubr.bf16.mxu0 %v1764_v3  ;;  %886 = vmatmul.mubr.bf16.vlgmr.msra.gmra.mrb[4].mxu1 %v619_v6 }
  0x59   : > { %1055 = vmatpush1.bf16.msra.mxu0 %v1633_v8  ;;  %1096 = vmatpush1.bf16.msra.mxu1 %v1636_v9 }
  0x5a   : > { %1127 = vmatprep.mubr.bf16.mxu1 %v1764_v3  ;;  %1056 = vmatprep.subr.bf16.mxu0 %v1641_v11  ;;  %v1650_v3 = vld [vmem:[%s2186_s2 + $0x4c] ss:$16 sps:$4 sm:$0xff]  }
  0x5b   : > { %1097 = vmatprep.subr.bf16.mxu1 %v1644_v12 }
  0x5d   : > { %1057 = vmatpush1.bf16.msra.mxu0 %v1639_v13  ;;  %1098 = vmatpush1.bf16.msra.mxu1 %v1642_v14 }
  0x5e   : > { %1058 = vmatprep.subr.bf16.mxu0 %v1647_v15  ;;  %1099 = vmatprep.subr.bf16.mxu1 %v1650_v3 }
  0x61   : > { %1059 = vmatpush1.bf16.msra.mxu0 %v1645_v16  ;;  %1100 = vmatpush1.bf16.msra.mxu1 %v1648_v17 }
  0x62   : > { %1060 = vmatprep.subr.bf16.mxu0 %v1653_v18  ;;  %1101 = vmatprep.subr.bf16.mxu1 %v1656_v19  ;;  %v1138_v18 = vlaneseq }
  0x64   : > { %v1139_v19 = vshrl.u32 %v1138_v18, 7 }
  0x65   : > { %1061 = vmatpush1.bf16.msra.mxu0 %v1651_v20  ;;  %1102 = vmatpush1.bf16.msra.mxu1 %v1654_v21  ;;  %v1136_v21 = vld [vmem:[%s2188_s4] sm:$0xf] }
  0x66   : > { %1062 = vmatprep.subr.bf16.mxu0 %v1659_v22  ;;  %1103 = vmatprep.subr.bf16.mxu1 %v1662_v23  ;;  %v1140_v20 = vsub.s32 0, %v1139_v19  ;;  %v1144_v22 = vsub.s32 1, %v1139_v19 }
  0x68   : > { %v1141_v23 = vrot.slane %v1136_v21, %v1140_v20 }
  0x69   : > { %1063 = vmatpush1.bf16.msra.mxu0 %v1657_v24  ;;  %1104 = vmatpush1.bf16.msra.mxu1 %v1660_v25 }
  0x6a   : > { %1064 = vmatprep.subr.bf16.mxu0 %v1665_v27  ;;  %1105 = vmatprep.subr.bf16.mxu1 %v1668_v29 }
  0x6d   : > { %1065 = vmatpush1.bf16.msra.mxu0 %v1663_v26  ;;  %1106 = vmatpush1.bf16.msra.mxu1 %v1666_v28  ;;  %v1145_v26 = vrot.slane %v1136_v21, %v1144_v22 }
  0x6e   : > { %1066 = vmatprep.subr.bf16.mxu0 %v1671_v30  ;;  %1107 = vmatprep.subr.bf16.mxu1 %v1674_v31 }
  0x71   : > { %1067 = vmatpush1.bf16.msra.mxu0 %v1669_v32  ;;  %1108 = vmatpush1.bf16.msra.mxu1 %v1672_v33  ;;  %v1152_v33 = vsub.s32 3, %v1139_v19 }
  0x72   : > { %1068 = vmatprep.subr.bf16.mxu0 %v1677_v34  ;;  %1109 = vmatprep.subr.bf16.mxu1 %v1680_v35 }
  0x75   : > { %1069 = vmatpush1.bf16.msra.mxu0 %v1675_v36  ;;  %1110 = vmatpush1.bf16.msra.mxu1 %v1678_v37 }
 0x10a   : > { %v506_v40 = vpop.f32.mrb[0].mxu0  ;;  %v547_v49 = vpop.f32.mrb[0].mxu1 }
 0x10b   : > { %v554_v41 = vadd.f32 %v506_v40, %v274_v38  ;;  %v508_v42 = vpop.f32.mrb[1].mxu0  ;;  %v549_v50 = vpop.f32.mrb[1].mxu1  ;;  %v556_v56 = vadd.f32 %v547_v49, %v276_v54  ;;  %v1162_v54 = vld [vmem:[#allocation5] sm:$0xff] }
 0x10c   : > { %v555_v43 = vadd.f32 %v508_v42, %v275_v39  ;;  %v510_v44 = vpop.f32.mrb[2].mxu0  ;;  %v557_v51 = vadd.f32 %v549_v50, %v277_v48  ;;  %v551_v52 = vpop.f32.mrb[2].mxu1  ;;  %v1153_v42 = vrot.slane %v1136_v21, %v1152_v33 }
 0x10d   : > { %v1404_v45 = vmul.f32 -1.442695, %v554_v41  ;;  %v511_v46 = vpop.f32.mrb[3].mxu0  ;;  %v552_v53 = vpop.f32.mrb[3].mxu1 }
 0x10e   : > { %v1405_v47 = vmul.f32 -1.442695, %v555_v43  ;;  %v1406_v55 = vmul.f32 -1.442695, %v557_v51  ;;  %v1148_v43 = vsub.s32 2, %v1139_v19 }
 0x10f   : > { %1681 = vpow2.f32 %v1404_v45 }
 0x110   : > { %1683 = vpow2.f32 %v1405_v47  ;;  %v1149_v45 = vrot.slane %v1136_v21, %v1148_v43 }
 0x111   : > { %1685 = vpow2.f32 %v1406_v55 }
 0x112   : > { %1687 = vtanh.f32 %v556_v56 }
 0x119   : > { %v1682_v57 = vpop.eup %1681 }
 0x11a   : > { %v1684_v58 = vpop.eup %1683  ;;  %v562_v59 = vadd.f32 1.0, %v1682_v57 }
 0x11b   : > { %v568_v60 = vadd.f32 1.0, %v1684_v58  ;;  %v1686_v61 = vpop.eup %1685 }
 0x11c   : > { %1689 = vrcp.f32 %v562_v59  ;;  %v1688_v62 = vpop.eup %1687  ;;  %v575_v1 = vadd.f32 1.0, %v1686_v61 }
 0x11d   : > { %1691 = vrcp.f32 %v568_v60 }
 0x11e   : > { %1693 = vrcp.f32 %v575_v1  ;;  %v1765_v1 = vmov (!%p1474_p5), 0.0  }
 0x11f   : > { %1498 = vmatprep.subr.bf16.mxu0 (!%p1474_p5), %v1765_v1 }
 0x126   : > { %v1690_v0 = vpop.eup %1689 }
 0x127   : > { %v1692_v2 = vpop.eup %1691  ;;  %v579_v4 = vmul.f32 %v1690_v0, %v1688_v62  ;;  %v1713_v0 = vld [vmem:[%s2189_s5] sm:$0xff] (!%p1474_p5)  }
 0x128   : > { %v578_v5 = vmul.f32 %v1692_v2, %v558_v63  ;;  %v1694_v7 = vpop.eup %1693  ;;  %v1714_v2 = vld [vmem:[%s2189_s5 + $0x8] sm:$0xff] (!%p1474_p5)  }
 0x12a   : > { %v580_v6 = vadd.f32 %v579_v4, %v578_v5  ;;  %v846_v11 = vpop.f32.mrb[4].mxu0  ;;  %v1715_v4 = vld [vmem:[%s2189_s5 + $0x10] sm:$0xff] (!%p1474_p5)   ;;  %v1716_v5 = vld [vmem:[%s2189_s5 + $0x18] sm:$0xff] (!%p1474_p5)  }
 0x12b   : > { %v848_v12 = vpop.f32.mrb[5].mxu0  ;;  %v887_v14 = vpop.f32.mrb[4].mxu1 }
 0x12c   : > { %1695 = vtanh.f32 %v580_v6  ;;  %584 = vst [vmem:[#allocation3] sm:$0xff] %v580_v6  ;;  %v850_v13 = vpop.f32.mrb[6].mxu0  ;;  %v889_v3 = vpop.f32.mrb[5].mxu1  ;;  %v1717_v6 = vld [vmem:[%s2189_s5 + $0x20] sm:$0xff] (!%p1474_p5)  }
 0x12d   : > { %v851_v15 = vpop.f32.mrb[7].mxu0  ;;  %v891_v16 = vpop.f32.mrb[6].mxu1 }
 0x12e   : > { %v892_v17 = vpop.f32.mrb[7].mxu1 }
 0x136   : > { %v1696_v8 = vpop.eup %1695 }
 0x137   : > { %v582_v9 = vmul.f32 %v1696_v8, %v1694_v7  ;;  %v1718_v7 = vld [vmem:[%s2189_s5 + $0x28] sm:$0xff] (!%p1474_p5)   ;;  %v1719_v8 = vld [vmem:[%s2189_s5 + $0x30] sm:$0xff] (!%p1474_p5)  }
 0x139   : > { %583 = vst [vmem:[#allocation2] sm:$0xff] %v582_v9  ;;  %v585_v10 = vpack.c.bf16 %v582_v9, %v582_v9  ;;  %v1720_v9 = vld [vmem:[%s2189_s5 + $0x38] sm:$0xff] (!%p1474_p5)  }
 0x13b   : > { %1087 = vmatmul.mubr.bf16.vlgmr.msra.gmra.mrb[8].mxu0 %v585_v10  ;;  %1128 = vmatmul.mubr.bf16.vlgmr.msra.gmra.mrb[8].mxu1 %v585_v10 }
 0x13c   : > { %1499 = vmatpush3.bf16.msra.mxu0 (!%p1474_p5), %v1713_v0  ;;  %1514 = vmatprep.mubr.msk.bf16.mxu0 (!%p1474_p5), %vm1766_vm0, %v1765_v1 }
 0x13d   : > { %1500 = vmatprep.subr.bf16.mxu0 (!%p1474_p5), %v1765_v1 }
 0x140   : > { %1501 = vmatpush3.bf16.msra.mxu0 (!%p1474_p5), %v1714_v2 }
 0x141   : > { %1502 = vmatprep.subr.bf16.mxu0 (!%p1474_p5), %v1765_v1 }
 0x144   : > { %1503 = vmatpush3.bf16.msra.mxu0 (!%p1474_p5), %v1715_v4 }
 0x145   : > { %1504 = vmatprep.subr.bf16.mxu0 (!%p1474_p5), %v1765_v1 }
 0x148   : > { %1505 = vmatpush3.bf16.msra.mxu0 (!%p1474_p5), %v1716_v5 }
 0x149   : > { %1506 = vmatprep.subr.bf16.mxu0 (!%p1474_p5), %v1765_v1 }
 0x14c   : > { %1507 = vmatpush3.bf16.msra.mxu0 (!%p1474_p5), %v1717_v6 }
 0x14d   : > { %1508 = vmatprep.subr.bf16.mxu0 (!%p1474_p5), %v1765_v1 }
 0x150   : > { %1509 = vmatpush3.bf16.msra.mxu0 (!%p1474_p5), %v1718_v7 }
 0x151   : > { %1510 = vmatprep.subr.bf16.mxu0 (!%p1474_p5), %v1765_v1 }
 0x154   : > { %1511 = vmatpush3.bf16.msra.mxu0 (!%p1474_p5), %v1719_v8 }
 0x155   : > { %1512 = vmatprep.subr.bf16.mxu0 (!%p1474_p5), %v1765_v1 }
 0x158   : > { %1513 = vmatpush3.bf16.msra.mxu0 (!%p1474_p5), %v1720_v9 }
 0x20e   : > { %v1088_v24 = vpop.f32.mrb[8].mxu0  ;;  %v1129_v25 = vpop.f32.mrb[8].mxu1 }
 0x20f   : > { %v1089_v27 = vadd.f32 %v1088_v24, %v846_v11  ;;  %v1130_v28 = vadd.f32 %v1129_v25, %v887_v14  ;;  %v1090_v29 = vpop.f32.mrb[9].mxu0  ;;  %v1131_v30 = vpop.f32.mrb[9].mxu1  ;;  %v1475_v11 = vld [vmem:[%s2190_s6] ss:$0 sm:$0xff] (!%p1474_p5) }
 0x210   : > { %v1091_v31 = vadd.f32 %v1090_v29, %v848_v12  ;;  %v1132_v32 = vadd.f32 %v1131_v30, %v889_v3  ;;  %v1092_v34 = vpop.f32.mrb[10].mxu0  ;;  %v1133_v35 = vpop.f32.mrb[10].mxu1 }
 0x211   : > { %v1158_v36 = vadd.f32 %v1141_v23, %v1089_v27  ;;  %v1093_v37 = vpop.f32.mrb[11].mxu0  ;;  %v1134_v38 = vpop.f32.mrb[11].mxu1  ;;  %v1160_v47 = vadd.f32 %v1149_v45, %v1130_v28 }
 0x212   : > { %v1159_v39 = vadd.f32 %v1145_v26, %v1091_v31  ;;  %v1161_v44 = vadd.f32 %v1153_v42, %v1132_v32 }
 0x213   : > { %v1471_v40 = vmul.f32 -1.442695, %v1158_v36 }
 0x214   : > { %v1472_v41 = vmul.f32 -1.442695, %v1159_v39  ;;  %v1473_v46 = vmul.f32 -1.442695, %v1161_v44 }
 0x215   : > { %1697 = vpow2.f32 %v1471_v40 }
 0x216   : > { %1699 = vpow2.f32 %v1472_v41 }
 0x217   : > { %1701 = vpow2.f32 %v1473_v46 }
 0x218   : > { %1703 = vtanh.f32 %v1160_v47 }
 0x21f   : > { %v1698_v48 = vpop.eup %1697 }
 0x220   : > { %v1700_v49 = vpop.eup %1699  ;;  %v1166_v50 = vadd.f32 1.0, %v1698_v48 }
 0x221   : > { %v1172_v51 = vadd.f32 1.0, %v1700_v49  ;;  %v1702_v52 = vpop.eup %1701 }
 0x222   : > { %1705 = vrcp.f32 %v1166_v50  ;;  %v1704_v53 = vpop.eup %1703  ;;  %v1179_v58 = vadd.f32 1.0, %v1702_v52 }
 0x223   : > { %1707 = vrcp.f32 %v1172_v51 }
 0x224   : > { %1709 = vrcp.f32 %v1179_v58 }
 0x22c   : > { %v1706_v55 = vpop.eup %1705 }
 0x22d   : > { %v1708_v56 = vpop.eup %1707  ;;  %v1183_v57 = vmul.f32 %v1706_v55, %v1704_v53 }
 0x22e   : > { %v1182_v59 = vmul.f32 %v1708_v56, %v1162_v54  ;;  %v1710_v61 = vpop.eup %1709 }
 0x230   : > { %v1184_v60 = vadd.f32 %v1183_v57, %v1182_v59 }
 0x232   : > { %1711 = vtanh.f32 %v1184_v60  ;;  %1188 = vst [vmem:[#allocation5] sm:$0xff] %v1184_v60 }
 0x239   : > { %1192 = sbr.rel (%p1474_p5) target bundleno = 1108 (0x454), region = 56 }
 0x23c   : > { %v1712_v62 = vpop.eup %1711 }
 0x23d   : > { %v1186_v63 = vmul.f32 %v1712_v62, %v1710_v61 }
 0x23f   : > { %1187 = vst [vmem:[#allocation4] sm:$0xff] %v1186_v63  ;;  %v1193_v10 = vpack.c.bf16 (!%p1474_p5), %v1186_v63, %v1186_v63 }
 0x241   : > { %1515 = vmatmul.mubr.bf16.vlgmr.msra.gmra.mrb[0].mxu0 %v1193_v10 }
 0x314   : > { %v1299_v12 = vpop.f32.mrb[0].mxu0 }
 0x315   : > { %v1300_v13 = vadd.f32 %v1475_v11, %v1299_v12  ;;  %v1516_v14 = vpop.f32.mrb[1].mxu0 }
 0x316   : > { %v1302_v15 = vpop.f32.mrb[2].mxu0 }
 0x317   : > { %v1517_v3 = vpop.f32.mrb[3].mxu0  ;;  %v1306_v16 = vsel %vm1305_vm1, %v1300_v13, -inf }
 0x318   : > { %1307 = vmax.xlane.f32.xlu0 %v1306_v16 }
 0x3a5   : > { %v1308_v17 = vpop.xlane.xlu0 %1307 }
 0x3a6   : > { %v1309_v18 = vsub.f32 %v1300_v13, %v1308_v17 }
 0x3a8   : > { %v1310_v19 = vmul.f32 1.442695, %v1309_v18 }
 0x3aa   : > { %1721 = vpow2.f32 %v1310_v19 }
 0x3b4   : > { %v1722_v20 = vpop.eup %1721 }
 0x3b5   : > { %v1312_v21 = vsel %vm1305_vm1, %v1722_v20, 0.0 }
 0x3b6   : > { %1313 = vadd.xlane.f32.xlu0 %v1312_v21 }
 0x443   : > { %v1314_v22 = vpop.xlane.xlu0 %1313 }
 0x444   : > { %1723 = vlog2.f32 %v1314_v22 }
 0x44e   : > { %v1724_v23 = vpop.eup %1723 }
 0x44f   : > { %v1316_v24 = vmul.f32 0.6931472, %v1724_v23 }
 0x451   : > { %v1317_v25 = vsub.f32 %v1309_v18, %v1316_v24 }
 0x453   : > { %1318 = vst.msk [vmem:[#allocation6] sm:$0xff] %vm1305_vm1, %v1317_v25 }
 0x454 PF: > { %p1522_p6 = scmp.eq.s32.totalorder %s1814_s25, 7  ;;  %s1767_s19 = smov [#allocation6]  }
 0x455   : > { %s1326_s30 = sshll.u32 %s1767_s19, 4  ;;  %s1327_s30 = int_to_ptr.vmem [resolvable:$true] %s1326_s30 }
 0x456   : > { %s1725_s20 = scalar_lea.vmem %s1327_s30, 128  ;;  %p1732_p10 = scmp.lt.s32.totalorder %s1327_s30, %s1327_s30 }
 0x457   : > { %p1726_p7 = scmp.ne.s32.totalorder %s1327_s30, %s1725_s20  ;;  %p1733_p11 = scmp.lt.s32.totalorder %s1725_s20, %s1725_s20 }
 0x459   : > { %p1727_p8 = pnand %p1726_p7, %p1522_p6  ;;  %p1734_p12 = por %p1733_p11, %p1732_p10 }
 0x45b   : > { %p1728_p9 = pneg %p1727_p8 }
 0x45d   : > { %p1735_p13 = pnand %p1734_p12, %p1728_p9 }
 0x45f   : > { %1738 = shalt.err (!%p1735_p13)
}
 0x460   : > { %s1739_s23 = scalar_lea.hbm %s2191_s7, 128 }
 0x461   : > { %p1740_p0 = scmp.ne.s32.totalorder %s2191_s7, %s1739_s23  ;;  %p1745_p3 = scmp.lt.u32.totalorder %s1739_s23, %s2191_s7 }
 0x463   : > { %p1741_p1 = pnand %p1740_p0, %p1522_p6 }
 0x465   : > { %p1742_p2 = pneg %p1741_p1 }
 0x467   : > { %p1747_p4 = pnand %p1745_p3, %p1742_p2 }
 0x469   : > { %1750 = shalt.err (!%p1747_p4)
}
 0x46a   : > { %1519 = dma.vmem_to_hbm [thread:$0]  (%p1522_p6), %s1327_s30, 128, %s2191_s7, [#allocation7]  }
 0x46b   : > { %1756 = dma.done.wait (%p1522_p6), [#allocation7], 128  }
 0x46c   : > { %1758 = vsyncadd (%p1522_p6), [#allocation7], 4294967168 }
 0x46d PF: > { %s18_s24 = sadd.s32 1, %s1761_s24  }
 0x46e   : > { %p15_p5 = scmp.ge.s32.totalorder %s18_s24, 10  }
 0x470   :  { %17 = sbr.rel (!%p15_p5) target bundleno = 1 (0x1), region = 83 }
 0x477   :  { %1339 = vsyncpa [#allocation7], 1 }
 0x478   :  { %1341 = vsyncpa [#allocation7 + $0x1], 1 }

</bundles_post_ra>
